<compile_context>
chip_gen: v7x
topology: tpu7x:2x2x1
jax: 0.10.0
libtpu: 0.0.40
codegen_flags: <defaults>
</compile_context>

<pallas_src>
import functools

import jax
import jax.numpy as jnp
from jax import lax
from jax.experimental import pallas as pl
from jax.experimental.pallas import tpu as pltpu


# ----------------------------------------------------------------------------
# Kernel
# ----------------------------------------------------------------------------
def make_deep_lstm_kernel(num_layers, T, Bp, H, input_size):
    """Builds a Pallas kernel for a `num_layers`-deep LSTM + 3-layer MLP head."""
    G = 4 * H  # stacked gate width (128 for H=32)

    def kernel(*refs):
        # refs layout:
        #   x_ref (T*Bp, I),
        #   (wi_l (in,4H), wh_l (H,4H), b_l (1,4H)) * num_layers,
        #   fc1_w, fc1_b, fc2_w, fc2_b, fco_w, fco_b,
        #   out_ref (Bp, out),
        #   seq_ref (T*Bp, H)   -- previous layer's hidden states
        #   xw_ref  (T*Bp, 4H)  -- precomputed input projections (+ bias)
        idx = 0
        x_ref = refs[idx]; idx += 1
        layer_refs = []
        for _ in range(num_layers):
            layer_refs.append(refs[idx:idx + 3])
            idx += 3
        fc1_w, fc1_b, fc2_w, fc2_b, fco_w, fco_b = refs[idx:idx + 6]
        idx += 6
        out_ref = refs[idx]
        seq_ref = refs[idx + 1]
        xw_ref = refs[idx + 2]

        h_last = jnp.zeros((Bp, H), jnp.float32)

        # Layers are a static (unrolled) Python loop; time is an unrolled fori_loop.
        for layer in range(num_layers):
            wi_ref, wh_ref, b_ref = layer_refs[layer]

            # ---- precompute input projections for all timesteps at once ----
            # (T*Bp, in) @ (in, 4H) + (1, 4H)  -> one well-shaped matmul,
            # bias folded in here (hoisted off the recurrent critical path).
            if layer == 0:
                x_all = x_ref[...]                       # (T*Bp, I)
            else:
                x_all = seq_ref[...]                     # (T*Bp, H)
            xw_ref[...] = (
                jnp.dot(x_all, wi_ref[...],
                        preferred_element_type=jnp.float32)
                + b_ref[...]
            )

            wh = wh_ref[...]                             # (H, 4H)
            last_layer = (layer == num_layers - 1)

            def step(t, carry, wh=wh, last_layer=last_layer):
                h, c = carry
                row = pl.multiple_of(t * Bp, Bp)
                # single lane-dense (Bp, 4H) gates tile: one MXU push per step
                gates = (
                    jnp.dot(h, wh, preferred_element_type=jnp.float32)
                    + xw_ref[pl.ds(row, Bp), :]
                )
                i_g = jax.nn.sigmoid(gates[:, 0 * H:1 * H])
                f_g = jax.nn.sigmoid(gates[:, 1 * H:2 * H])
                g_g = jnp.tanh(gates[:, 2 * H:3 * H])
                o_g = jax.nn.sigmoid(gates[:, 3 * H:4 * H])
                c_new = f_g * c + i_g * g_g
                h_new = o_g * jnp.tanh(c_new)
                if not last_layer:
                    # next layer reads this as its input sequence
                    seq_ref[pl.ds(row, Bp), :] = h_new
                return (h_new, c_new)

            h0 = jnp.zeros((Bp, H), jnp.float32)
            c0 = jnp.zeros((Bp, H), jnp.float32)
            h_last, _ = lax.fori_loop(0, T, step, (h0, c0), unroll=True)

        # MLP head on the last timestep's hidden state (out[:, -1, :]).
        o1 = jnp.maximum(
            jnp.dot(h_last, fc1_w[...], preferred_element_type=jnp.float32)
            + fc1_b[...], 0.0)
        o2 = jnp.maximum(
            jnp.dot(o1, fc2_w[...], preferred_element_type=jnp.float32)
            + fc2_b[...], 0.0)
        out_ref[...] = (
            jnp.dot(o2, fco_w[...], preferred_element_type=jnp.float32)
            + fco_b[...])

    return kernel


# ----------------------------------------------------------------------------
# Wrapper
# ----------------------------------------------------------------------------
def deep_lstm_net(x, params, *, hidden_size, num_layers, output_size):
    """x: (B, T, input_size) float32, batch_first like PyTorch."""
    B, T, I = x.shape
    H = hidden_size
    Bp = ((B + 7) // 8) * 8            # pad batch to full 8-sublane tiles
    Bp = max(Bp, 8)

    x_tm = jnp.transpose(x, (1, 0, 2)).astype(jnp.float32)   # (T, B, I)
    if Bp != B:
        x_tm = jnp.pad(x_tm, ((0, 0), (0, Bp - B), (0, 0)))
    x_flat = x_tm.reshape(T * Bp, I)                          # time-major, flattened

    kernel = make_deep_lstm_kernel(num_layers, T, Bp, H, I)

    inputs = [x_flat]
    for l in range(num_layers):
        wi, wh, b = params["lstm"][l]
        inputs += [wi, wh, b]
    inputs += [params["fc1_w"], params["fc1_b"],
               params["fc2_w"], params["fc2_b"],
               params["fco_w"], params["fco_b"]]

    vmem_spec = pl.BlockSpec(memory_space=pltpu.MemorySpace.VMEM)

    # TODO(synk): if batch grows, add a leading grid axis over batch shards with
    # dimension_semantics=("parallel",) so the second TensorCore on v7x is used.
    out = pl.pallas_call(
        kernel,
        out_shape=jax.ShapeDtypeStruct((Bp, output_size), jnp.float32),
        in_specs=[vmem_spec] * len(inputs),
        out_specs=vmem_spec,
        scratch_shapes=[pltpu.VMEM((T * Bp, H), jnp.float32),      # seq
                        pltpu.VMEM((T * Bp, 4 * H), jnp.float32)], # xW + bias
    )(*inputs)
    return out[:B]


# ----------------------------------------------------------------------------
# Deterministic parameter init (PyTorch-style uniform(-1/sqrt(H), 1/sqrt(H)))
# Gate-flattened layout: W_ih^T -> (in, 4H), W_hh^T -> (H, 4H), bias -> (1, 4H),
# with gate order [i, f, g, o] along the columns.
# ----------------------------------------------------------------------------
def init_params(key, input_size, hidden_size, num_layers, output_size):
    H = hidden_size
    stdv = 1.0 / jnp.sqrt(jnp.float32(H))

    def uni(key, shape):
        return jax.random.uniform(key, shape, jnp.float32, -stdv, stdv)

    params = {"lstm": []}
    for l in range(num_layers):
        in_dim = input_size if l == 0 else H
        key, k1, k2, k3, k4 = jax.random.split(key, 5)
        wi = uni(k1, (in_dim, 4 * H))                      # stacked, transposed W_ih
        wh = uni(k2, (H, 4 * H))                           # stacked, transposed W_hh
        b = uni(k3, (1, 4 * H)) + uni(k4, (1, 4 * H))      # b_ih + b_hh
        params["lstm"].append((wi, wh, b))

    key, k1, k2, k3, k4, k5, k6 = jax.random.split(key, 7)
    params["fc1_w"] = uni(k1, (H, H))
    params["fc1_b"] = uni(k2, (1, H))
    params["fc2_w"] = uni(k3, (H, H))
    params["fc2_b"] = uni(k4, (1, H))
    params["fco_w"] = uni(k5, (H, output_size))
    params["fco_b"] = uni(k6, (1, output_size))
    return params


# ----------------------------------------------------------------------------
# Pure-JAX reference (mirrors PyTorch nn.LSTM + MLP head semantics)
# ----------------------------------------------------------------------------
def reference(x, params, *, hidden_size, num_layers):
    B, T, _ = x.shape
    H = hidden_size
    seq = x.astype(jnp.float32)
    for l in range(num_layers):
        wi, wh, b = params["lstm"][l]
        h = jnp.zeros((B, H), jnp.float32)
        c = jnp.zeros((B, H), jnp.float32)
        outs = []
        for t in range(T):
            x_t = seq[:, t, :]
            gates = x_t @ wi + h @ wh + b
            i_g = jax.nn.sigmoid(gates[:, 0 * H:1 * H])
            f_g = jax.nn.sigmoid(gates[:, 1 * H:2 * H])
            g_g = jnp.tanh(gates[:, 2 * H:3 * H])
            o_g = jax.nn.sigmoid(gates[:, 3 * H:4 * H])
            c = f_g * c + i_g * g_g
            h = o_g * jnp.tanh(c)
            outs.append(h)
        seq = jnp.stack(outs, axis=1)
    h_last = seq[:, -1, :]
    o1 = jnp.maximum(h_last @ params["fc1_w"] + params["fc1_b"], 0.0)
    o2 = jnp.maximum(o1 @ params["fc2_w"] + params["fc2_b"], 0.0)
    return o2 @ params["fco_w"] + params["fco_b"]


# ----------------------------------------------------------------------------
if __name__ == "__main__":
    INPUT_SIZE = 16
    HIDDEN = 32
    NUM_LAYERS = 2
    OUTPUT = 45
    B, T = 4, 8

    key = jax.random.PRNGKey(0)
    key, kx, kp = jax.random.split(key, 3)
    x = jax.random.normal(kx, (B, T, INPUT_SIZE), jnp.float32)
    params = init_params(kp, INPUT_SIZE, HIDDEN, NUM_LAYERS, OUTPUT)

    fwd = functools.partial(deep_lstm_net, hidden_size=HIDDEN,
                            num_layers=NUM_LAYERS, output_size=OUTPUT)
    out = jax.jit(fwd)(x, params)
    out = jax.block_until_ready(out)

    ref = reference(x, params, hidden_size=HIDDEN, num_layers=NUM_LAYERS)
    assert out.shape == (B, OUTPUT)
    assert jnp.allclose(out, ref, rtol=1e-4, atol=1e-4), (
        f"max err {jnp.max(jnp.abs(out - ref))}")

    print("KERNEL_OK")
</pallas_src>

<mosaic_0001>
module attributes {stable_mosaic.version = 11 : i64} {
  func.func @kernel(%arg0: memref<64x16xf32, #tpu.memory_space<vmem>>, %arg1: memref<16x128xf32, #tpu.memory_space<vmem>>, %arg2: memref<32x128xf32, #tpu.memory_space<vmem>>, %arg3: memref<1x128xf32, #tpu.memory_space<vmem>>, %arg4: memref<32x128xf32, #tpu.memory_space<vmem>>, %arg5: memref<32x128xf32, #tpu.memory_space<vmem>>, %arg6: memref<1x128xf32, #tpu.memory_space<vmem>>, %arg7: memref<32x32xf32, #tpu.memory_space<vmem>>, %arg8: memref<1x32xf32, #tpu.memory_space<vmem>>, %arg9: memref<32x32xf32, #tpu.memory_space<vmem>>, %arg10: memref<1x32xf32, #tpu.memory_space<vmem>>, %arg11: memref<32x45xf32, #tpu.memory_space<vmem>>, %arg12: memref<1x45xf32, #tpu.memory_space<vmem>>, %arg13: memref<8x45xf32, #tpu.memory_space<vmem>>, %arg14: memref<64x32xf32, #tpu.memory_space<vmem>>, %arg15: memref<64x128xf32, #tpu.memory_space<vmem>>) attributes {dimension_semantics = [], scalar_prefetch = 0 : i64, scratch_operands = 2 : i64, tpu.core_type = #tpu.core_type<tc>} {
    %c0 = arith.constant 0 : index
    %c0_0 = arith.constant 0 : index
    %0 = vector.load %arg0[%c0, %c0_0] : memref<64x16xf32, #tpu.memory_space<vmem>>, vector<64x16xf32>
    %c0_1 = arith.constant 0 : index
    %c0_2 = arith.constant 0 : index
    %1 = vector.load %arg1[%c0_1, %c0_2] : memref<16x128xf32, #tpu.memory_space<vmem>>, vector<16x128xf32>
    %cst = arith.constant dense<0.000000e+00> : vector<64x128xf32>
    %2 = tpu.matmul %0, %1, %cst {dimension_numbers = #tpu.dot_dimension_numbers<[1], [0], [0], [1], [0, 0, 1, 1], [], []>} : vector<64x16xf32>, vector<16x128xf32>, vector<64x128xf32> -> vector<64x128xf32>
    %c0_3 = arith.constant 0 : index
    %c0_4 = arith.constant 0 : index
    %3 = vector.load %arg3[%c0_3, %c0_4] : memref<1x128xf32, #tpu.memory_space<vmem>>, vector<1x128xf32>
    %4 = vector.broadcast %3 : vector<1x128xf32> to vector<64x128xf32>
    %5 = arith.addf %2, %4 : vector<64x128xf32>
    %c0_5 = arith.constant 0 : index
    %c0_6 = arith.constant 0 : index
    %6 = vector.load %arg15[%c0_5, %c0_6] : memref<64x128xf32, #tpu.memory_space<vmem>>, vector<64x128xf32>
    tpu.vector_store %arg15[%c0_5, %c0_6], %5 {strides = array<i32>} : memref<64x128xf32, #tpu.memory_space<vmem>>, vector<64x128xf32>,
    %c0_7 = arith.constant 0 : index
    %c0_8 = arith.constant 0 : index
    %7 = vector.load %arg2[%c0_7, %c0_8] : memref<32x128xf32, #tpu.memory_space<vmem>>, vector<32x128xf32>
    %cst_9 = arith.constant 0.000000e+00 : f32
    %8 = vector.broadcast %cst_9 : f32 to vector<8x32xf32>
    %cst_10 = arith.constant 0.000000e+00 : f32
    %9 = vector.broadcast %cst_10 : f32 to vector<8x32xf32>
    %c0_i32 = arith.constant 0 : i32
    %c8_i32 = arith.constant 8 : i32
    %10 = arith.muli %c0_i32, %c8_i32 : i32
    %11 = tpu.assume_multiple %10, 8 : i32
    %cst_11 = arith.constant dense<0.000000e+00> : vector<8x128xf32>
    %12 = tpu.matmul %8, %7, %cst_11 {dimension_numbers = #tpu.dot_dimension_numbers<[1], [0], [0], [1], [0, 0, 1, 1], [], []>} : vector<8x32xf32>, vector<32x128xf32>, vector<8x128xf32> -> vector<8x128xf32>
    %13 = arith.index_cast %11 : i32 to index
    %c0_12 = arith.constant 0 : index
    %14 = vector.load %arg15[%13, %c0_12] : memref<64x128xf32, #tpu.memory_space<vmem>>, vector<8x128xf32>
    %15 = arith.addf %12, %14 : vector<8x128xf32>
    %16 = vector.extract_strided_slice %15 {offsets = [0, 0], sizes = [8, 32], strides = [1, 1]} : vector<8x128xf32> to vector<8x32xf32>
    %17 = arith.negf %16 : vector<8x32xf32>
    %18 = math.exp %17 : vector<8x32xf32>
    %cst_13 = arith.constant 1.000000e+00 : f32
    %19 = vector.broadcast %cst_13 : f32 to vector<8x32xf32>
    %20 = arith.addf %19, %18 : vector<8x32xf32>
    %21 = arith.divf %19, %20 : vector<8x32xf32>
    %22 = vector.extract_strided_slice %15 {offsets = [0, 32], sizes = [8, 32], strides = [1, 1]} : vector<8x128xf32> to vector<8x32xf32>
    %23 = arith.negf %22 : vector<8x32xf32>
    %24 = math.exp %23 : vector<8x32xf32>
    %cst_14 = arith.constant 1.000000e+00 : f32
    %25 = vector.broadcast %cst_14 : f32 to vector<8x32xf32>
    %26 = arith.addf %25, %24 : vector<8x32xf32>
    %27 = arith.divf %25, %26 : vector<8x32xf32>
    %28 = vector.extract_strided_slice %15 {offsets = [0, 64], sizes = [8, 32], strides = [1, 1]} : vector<8x128xf32> to vector<8x32xf32>
    %29 = math.tanh %28 : vector<8x32xf32>
    %30 = vector.extract_strided_slice %15 {offsets = [0, 96], sizes = [8, 32], strides = [1, 1]} : vector<8x128xf32> to vector<8x32xf32>
    %31 = arith.negf %30 : vector<8x32xf32>
    %32 = math.exp %31 : vector<8x32xf32>
    %cst_15 = arith.constant 1.000000e+00 : f32
    %33 = vector.broadcast %cst_15 : f32 to vector<8x32xf32>
    %34 = arith.addf %33, %32 : vector<8x32xf32>
    %35 = arith.divf %33, %34 : vector<8x32xf32>
    %36 = arith.mulf %27, %9 : vector<8x32xf32>
    %37 = arith.mulf %21, %29 : vector<8x32xf32>
    %38 = arith.addf %36, %37 : vector<8x32xf32>
    %39 = math.tanh %38 : vector<8x32xf32>
    %40 = arith.mulf %35, %39 : vector<8x32xf32>
    %41 = arith.index_cast %11 : i32 to index
    %c0_16 = arith.constant 0 : index
    %42 = vector.load %arg14[%41, %c0_16] : memref<64x32xf32, #tpu.memory_space<vmem>>, vector<8x32xf32>
    tpu.vector_store %arg14[%41, %c0_16], %40 {strides = array<i32>} : memref<64x32xf32, #tpu.memory_space<vmem>>, vector<8x32xf32>,
    %c1_i32 = arith.constant 1 : i32
    %c8_i32_17 = arith.constant 8 : i32
    %43 = arith.muli %c1_i32, %c8_i32_17 : i32
    %44 = tpu.assume_multiple %43, 8 : i32
    %cst_18 = arith.constant dense<0.000000e+00> : vector<8x128xf32>
    %45 = tpu.matmul %40, %7, %cst_18 {dimension_numbers = #tpu.dot_dimension_numbers<[1], [0], [0], [1], [0, 0, 1, 1], [], []>} : vector<8x32xf32>, vector<32x128xf32>, vector<8x128xf32> -> vector<8x128xf32>
    %46 = arith.index_cast %44 : i32 to index
    %c0_19 = arith.constant 0 : index
    %47 = vector.load %arg15[%46, %c0_19] : memref<64x128xf32, #tpu.memory_space<vmem>>, vector<8x128xf32>
    %48 = arith.addf %45, %47 : vector<8x128xf32>
    %49 = vector.extract_strided_slice %48 {offsets = [0, 0], sizes = [8, 32], strides = [1, 1]} : vector<8x128xf32> to vector<8x32xf32>
    %50 = arith.negf %49 : vector<8x32xf32>
    %51 = math.exp %50 : vector<8x32xf32>
    %cst_20 = arith.constant 1.000000e+00 : f32
    %52 = vector.broadcast %cst_20 : f32 to vector<8x32xf32>
    %53 = arith.addf %52, %51 : vector<8x32xf32>
    %54 = arith.divf %52, %53 : vector<8x32xf32>
    %55 = vector.extract_strided_slice %48 {offsets = [0, 32], sizes = [8, 32], strides = [1, 1]} : vector<8x128xf32> to vector<8x32xf32>
    %56 = arith.negf %55 : vector<8x32xf32>
    %57 = math.exp %56 : vector<8x32xf32>
    %cst_21 = arith.constant 1.000000e+00 : f32
    %58 = vector.broadcast %cst_21 : f32 to vector<8x32xf32>
    %59 = arith.addf %58, %57 : vector<8x32xf32>
    %60 = arith.divf %58, %59 : vector<8x32xf32>
    %61 = vector.extract_strided_slice %48 {offsets = [0, 64], sizes = [8, 32], strides = [1, 1]} : vector<8x128xf32> to vector<8x32xf32>
    %62 = math.tanh %61 : vector<8x32xf32>
    %63 = vector.extract_strided_slice %48 {offsets = [0, 96], sizes = [8, 32], strides = [1, 1]} : vector<8x128xf32> to vector<8x32xf32>
    %64 = arith.negf %63 : vector<8x32xf32>
    %65 = math.exp %64 : vector<8x32xf32>
    %cst_22 = arith.constant 1.000000e+00 : f32
    %66 = vector.broadcast %cst_22 : f32 to vector<8x32xf32>
    %67 = arith.addf %66, %65 : vector<8x32xf32>
    %68 = arith.divf %66, %67 : vector<8x32xf32>
    %69 = arith.mulf %60, %38 : vector<8x32xf32>
    %70 = arith.mulf %54, %62 : vector<8x32xf32>
    %71 = arith.addf %69, %70 : vector<8x32xf32>
    %72 = math.tanh %71 : vector<8x32xf32>
    %73 = arith.mulf %68, %72 : vector<8x32xf32>
    %74 = arith.index_cast %44 : i32 to index
    %c0_23 = arith.constant 0 : index
    %75 = vector.load %arg14[%74, %c0_23] : memref<64x32xf32, #tpu.memory_space<vmem>>, vector<8x32xf32>
    tpu.vector_store %arg14[%74, %c0_23], %73 {strides = array<i32>} : memref<64x32xf32, #tpu.memory_space<vmem>>, vector<8x32xf32>,
    %c2_i32 = arith.constant 2 : i32
    %c8_i32_24 = arith.constant 8 : i32
    %76 = arith.muli %c2_i32, %c8_i32_24 : i32
    %77 = tpu.assume_multiple %76, 8 : i32
    %cst_25 = arith.constant dense<0.000000e+00> : vector<8x128xf32>
    %78 = tpu.matmul %73, %7, %cst_25 {dimension_numbers = #tpu.dot_dimension_numbers<[1], [0], [0], [1], [0, 0, 1, 1], [], []>} : vector<8x32xf32>, vector<32x128xf32>, vector<8x128xf32> -> vector<8x128xf32>
    %79 = arith.index_cast %77 : i32 to index
    %c0_26 = arith.constant 0 : index
    %80 = vector.load %arg15[%79, %c0_26] : memref<64x128xf32, #tpu.memory_space<vmem>>, vector<8x128xf32>
    %81 = arith.addf %78, %80 : vector<8x128xf32>
    %82 = vector.extract_strided_slice %81 {offsets = [0, 0], sizes = [8, 32], strides = [1, 1]} : vector<8x128xf32> to vector<8x32xf32>
    %83 = arith.negf %82 : vector<8x32xf32>
    %84 = math.exp %83 : vector<8x32xf32>
    %cst_27 = arith.constant 1.000000e+00 : f32
    %85 = vector.broadcast %cst_27 : f32 to vector<8x32xf32>
    %86 = arith.addf %85, %84 : vector<8x32xf32>
    %87 = arith.divf %85, %86 : vector<8x32xf32>
    %88 = vector.extract_strided_slice %81 {offsets = [0, 32], sizes = [8, 32], strides = [1, 1]} : vector<8x128xf32> to vector<8x32xf32>
    %89 = arith.negf %88 : vector<8x32xf32>
    %90 = math.exp %89 : vector<8x32xf32>
    %cst_28 = arith.constant 1.000000e+00 : f32
    %91 = vector.broadcast %cst_28 : f32 to vector<8x32xf32>
    %92 = arith.addf %91, %90 : vector<8x32xf32>
    %93 = arith.divf %91, %92 : vector<8x32xf32>
    %94 = vector.extract_strided_slice %81 {offsets = [0, 64], sizes = [8, 32], strides = [1, 1]} : vector<8x128xf32> to vector<8x32xf32>
    %95 = math.tanh %94 : vector<8x32xf32>
    %96 = vector.extract_strided_slice %81 {offsets = [0, 96], sizes = [8, 32], strides = [1, 1]} : vector<8x128xf32> to vector<8x32xf32>
    %97 = arith.negf %96 : vector<8x32xf32>
    %98 = math.exp %97 : vector<8x32xf32>
    %cst_29 = arith.constant 1.000000e+00 : f32
    %99 = vector.broadcast %cst_29 : f32 to vector<8x32xf32>
    %100 = arith.addf %99, %98 : vector<8x32xf32>
    %101 = arith.divf %99, %100 : vector<8x32xf32>
    %102 = arith.mulf %93, %71 : vector<8x32xf32>
    %103 = arith.mulf %87, %95 : vector<8x32xf32>
    %104 = arith.addf %102, %103 : vector<8x32xf32>
    %105 = math.tanh %104 : vector<8x32xf32>
    %106 = arith.mulf %101, %105 : vector<8x32xf32>
    %107 = arith.index_cast %77 : i32 to index
    %c0_30 = arith.constant 0 : index
    %108 = vector.load %arg14[%107, %c0_30] : memref<64x32xf32, #tpu.memory_space<vmem>>, vector<8x32xf32>
    tpu.vector_store %arg14[%107, %c0_30], %106 {strides = array<i32>} : memref<64x32xf32, #tpu.memory_space<vmem>>, vector<8x32xf32>,
    %c3_i32 = arith.constant 3 : i32
    %c8_i32_31 = arith.constant 8 : i32
    %109 = arith.muli %c3_i32, %c8_i32_31 : i32
    %110 = tpu.assume_multiple %109, 8 : i32
    %cst_32 = arith.constant dense<0.000000e+00> : vector<8x128xf32>
    %111 = tpu.matmul %106, %7, %cst_32 {dimension_numbers = #tpu.dot_dimension_numbers<[1], [0], [0], [1], [0, 0, 1, 1], [], []>} : vector<8x32xf32>, vector<32x128xf32>, vector<8x128xf32> -> vector<8x128xf32>
    %112 = arith.index_cast %110 : i32 to index
    %c0_33 = arith.constant 0 : index
    %113 = vector.load %arg15[%112, %c0_33] : memref<64x128xf32, #tpu.memory_space<vmem>>, vector<8x128xf32>
    %114 = arith.addf %111, %113 : vector<8x128xf32>
    %115 = vector.extract_strided_slice %114 {offsets = [0, 0], sizes = [8, 32], strides = [1, 1]} : vector<8x128xf32> to vector<8x32xf32>
    %116 = arith.negf %115 : vector<8x32xf32>
    %117 = math.exp %116 : vector<8x32xf32>
    %cst_34 = arith.constant 1.000000e+00 : f32
    %118 = vector.broadcast %cst_34 : f32 to vector<8x32xf32>
    %119 = arith.addf %118, %117 : vector<8x32xf32>
    %120 = arith.divf %118, %119 : vector<8x32xf32>
    %121 = vector.extract_strided_slice %114 {offsets = [0, 32], sizes = [8, 32], strides = [1, 1]} : vector<8x128xf32> to vector<8x32xf32>
    %122 = arith.negf %121 : vector<8x32xf32>
    %123 = math.exp %122 : vector<8x32xf32>
    %cst_35 = arith.constant 1.000000e+00 : f32
    %124 = vector.broadcast %cst_35 : f32 to vector<8x32xf32>
    %125 = arith.addf %124, %123 : vector<8x32xf32>
    %126 = arith.divf %124, %125 : vector<8x32xf32>
    %127 = vector.extract_strided_slice %114 {offsets = [0, 64], sizes = [8, 32], strides = [1, 1]} : vector<8x128xf32> to vector<8x32xf32>
    %128 = math.tanh %127 : vector<8x32xf32>
    %129 = vector.extract_strided_slice %114 {offsets = [0, 96], sizes = [8, 32], strides = [1, 1]} : vector<8x128xf32> to vector<8x32xf32>
    %130 = arith.negf %129 : vector<8x32xf32>
    %131 = math.exp %130 : vector<8x32xf32>
    %cst_36 = arith.constant 1.000000e+00 : f32
    %132 = vector.broadcast %cst_36 : f32 to vector<8x32xf32>
    %133 = arith.addf %132, %131 : vector<8x32xf32>
    %134 = arith.divf %132, %133 : vector<8x32xf32>
    %135 = arith.mulf %126, %104 : vector<8x32xf32>
    %136 = arith.mulf %120, %128 : vector<8x32xf32>
    %137 = arith.addf %135, %136 : vector<8x32xf32>
    %138 = math.tanh %137 : vector<8x32xf32>
    %139 = arith.mulf %134, %138 : vector<8x32xf32>
    %140 = arith.index_cast %110 : i32 to index
    %c0_37 = arith.constant 0 : index
    %141 = vector.load %arg14[%140, %c0_37] : memref<64x32xf32, #tpu.memory_space<vmem>>, vector<8x32xf32>
    tpu.vector_store %arg14[%140, %c0_37], %139 {strides = array<i32>} : memref<64x32xf32, #tpu.memory_space<vmem>>, vector<8x32xf32>,
    %c4_i32 = arith.constant 4 : i32
    %c8_i32_38 = arith.constant 8 : i32
    %142 = arith.muli %c4_i32, %c8_i32_38 : i32
    %143 = tpu.assume_multiple %142, 8 : i32
    %cst_39 = arith.constant dense<0.000000e+00> : vector<8x128xf32>
    %144 = tpu.matmul %139, %7, %cst_39 {dimension_numbers = #tpu.dot_dimension_numbers<[1], [0], [0], [1], [0, 0, 1, 1], [], []>} : vector<8x32xf32>, vector<32x128xf32>, vector<8x128xf32> -> vector<8x128xf32>
    %145 = arith.index_cast %143 : i32 to index
    %c0_40 = arith.constant 0 : index
    %146 = vector.load %arg15[%145, %c0_40] : memref<64x128xf32, #tpu.memory_space<vmem>>, vector<8x128xf32>
    %147 = arith.addf %144, %146 : vector<8x128xf32>
    %148 = vector.extract_strided_slice %147 {offsets = [0, 0], sizes = [8, 32], strides = [1, 1]} : vector<8x128xf32> to vector<8x32xf32>
    %149 = arith.negf %148 : vector<8x32xf32>
    %150 = math.exp %149 : vector<8x32xf32>
    %cst_41 = arith.constant 1.000000e+00 : f32
    %151 = vector.broadcast %cst_41 : f32 to vector<8x32xf32>
    %152 = arith.addf %151, %150 : vector<8x32xf32>
    %153 = arith.divf %151, %152 : vector<8x32xf32>
    %154 = vector.extract_strided_slice %147 {offsets = [0, 32], sizes = [8, 32], strides = [1, 1]} : vector<8x128xf32> to vector<8x32xf32>
    %155 = arith.negf %154 : vector<8x32xf32>
    %156 = math.exp %155 : vector<8x32xf32>
    %cst_42 = arith.constant 1.000000e+00 : f32
    %157 = vector.broadcast %cst_42 : f32 to vector<8x32xf32>
    %158 = arith.addf %157, %156 : vector<8x32xf32>
    %159 = arith.divf %157, %158 : vector<8x32xf32>
    %160 = vector.extract_strided_slice %147 {offsets = [0, 64], sizes = [8, 32], strides = [1, 1]} : vector<8x128xf32> to vector<8x32xf32>
    %161 = math.tanh %160 : vector<8x32xf32>
    %162 = vector.extract_strided_slice %147 {offsets = [0, 96], sizes = [8, 32], strides = [1, 1]} : vector<8x128xf32> to vector<8x32xf32>
    %163 = arith.negf %162 : vector<8x32xf32>
    %164 = math.exp %163 : vector<8x32xf32>
    %cst_43 = arith.constant 1.000000e+00 : f32
    %165 = vector.broadcast %cst_43 : f32 to vector<8x32xf32>
    %166 = arith.addf %165, %164 : vector<8x32xf32>
    %167 = arith.divf %165, %166 : vector<8x32xf32>
    %168 = arith.mulf %159, %137 : vector<8x32xf32>
    %169 = arith.mulf %153, %161 : vector<8x32xf32>
    %170 = arith.addf %168, %169 : vector<8x32xf32>
    %171 = math.tanh %170 : vector<8x32xf32>
    %172 = arith.mulf %167, %171 : vector<8x32xf32>
    %173 = arith.index_cast %143 : i32 to index
    %c0_44 = arith.constant 0 : index
    %174 = vector.load %arg14[%173, %c0_44] : memref<64x32xf32, #tpu.memory_space<vmem>>, vector<8x32xf32>
    tpu.vector_store %arg14[%173, %c0_44], %172 {strides = array<i32>} : memref<64x32xf32, #tpu.memory_space<vmem>>, vector<8x32xf32>,
    %c5_i32 = arith.constant 5 : i32
    %c8_i32_45 = arith.constant 8 : i32
    %175 = arith.muli %c5_i32, %c8_i32_45 : i32
    %176 = tpu.assume_multiple %175, 8 : i32
    %cst_46 = arith.constant dense<0.000000e+00> : vector<8x128xf32>
    %177 = tpu.matmul %172, %7, %cst_46 {dimension_numbers = #tpu.dot_dimension_numbers<[1], [0], [0], [1], [0, 0, 1, 1], [], []>} : vector<8x32xf32>, vector<32x128xf32>, vector<8x128xf32> -> vector<8x128xf32>
    %178 = arith.index_cast %176 : i32 to index
    %c0_47 = arith.constant 0 : index
    %179 = vector.load %arg15[%178, %c0_47] : memref<64x128xf32, #tpu.memory_space<vmem>>, vector<8x128xf32>
    %180 = arith.addf %177, %179 : vector<8x128xf32>
    %181 = vector.extract_strided_slice %180 {offsets = [0, 0], sizes = [8, 32], strides = [1, 1]} : vector<8x128xf32> to vector<8x32xf32>
    %182 = arith.negf %181 : vector<8x32xf32>
    %183 = math.exp %182 : vector<8x32xf32>
    %cst_48 = arith.constant 1.000000e+00 : f32
    %184 = vector.broadcast %cst_48 : f32 to vector<8x32xf32>
    %185 = arith.addf %184, %183 : vector<8x32xf32>
    %186 = arith.divf %184, %185 : vector<8x32xf32>
    %187 = vector.extract_strided_slice %180 {offsets = [0, 32], sizes = [8, 32], strides = [1, 1]} : vector<8x128xf32> to vector<8x32xf32>
    %188 = arith.negf %187 : vector<8x32xf32>
    %189 = math.exp %188 : vector<8x32xf32>
    %cst_49 = arith.constant 1.000000e+00 : f32
    %190 = vector.broadcast %cst_49 : f32 to vector<8x32xf32>
    %191 = arith.addf %190, %189 : vector<8x32xf32>
    %192 = arith.divf %190, %191 : vector<8x32xf32>
    %193 = vector.extract_strided_slice %180 {offsets = [0, 64], sizes = [8, 32], strides = [1, 1]} : vector<8x128xf32> to vector<8x32xf32>
    %194 = math.tanh %193 : vector<8x32xf32>
    %195 = vector.extract_strided_slice %180 {offsets = [0, 96], sizes = [8, 32], strides = [1, 1]} : vector<8x128xf32> to vector<8x32xf32>
    %196 = arith.negf %195 : vector<8x32xf32>
    %197 = math.exp %196 : vector<8x32xf32>
    %cst_50 = arith.constant 1.000000e+00 : f32
    %198 = vector.broadcast %cst_50 : f32 to vector<8x32xf32>
    %199 = arith.addf %198, %197 : vector<8x32xf32>
    %200 = arith.divf %198, %199 : vector<8x32xf32>
    %201 = arith.mulf %192, %170 : vector<8x32xf32>
    %202 = arith.mulf %186, %194 : vector<8x32xf32>
    %203 = arith.addf %201, %202 : vector<8x32xf32>
    %204 = math.tanh %203 : vector<8x32xf32>
    %205 = arith.mulf %200, %204 : vector<8x32xf32>
    %206 = arith.index_cast %176 : i32 to index
    %c0_51 = arith.constant 0 : index
    %207 = vector.load %arg14[%206, %c0_51] : memref<64x32xf32, #tpu.memory_space<vmem>>, vector<8x32xf32>
    tpu.vector_store %arg14[%206, %c0_51], %205 {strides = array<i32>} : memref<64x32xf32, #tpu.memory_space<vmem>>, vector<8x32xf32>,
    %c6_i32 = arith.constant 6 : i32
    %c8_i32_52 = arith.constant 8 : i32
    %208 = arith.muli %c6_i32, %c8_i32_52 : i32
    %209 = tpu.assume_multiple %208, 8 : i32
    %cst_53 = arith.constant dense<0.000000e+00> : vector<8x128xf32>
    %210 = tpu.matmul %205, %7, %cst_53 {dimension_numbers = #tpu.dot_dimension_numbers<[1], [0], [0], [1], [0, 0, 1, 1], [], []>} : vector<8x32xf32>, vector<32x128xf32>, vector<8x128xf32> -> vector<8x128xf32>
    %211 = arith.index_cast %209 : i32 to index
    %c0_54 = arith.constant 0 : index
    %212 = vector.load %arg15[%211, %c0_54] : memref<64x128xf32, #tpu.memory_space<vmem>>, vector<8x128xf32>
    %213 = arith.addf %210, %212 : vector<8x128xf32>
    %214 = vector.extract_strided_slice %213 {offsets = [0, 0], sizes = [8, 32], strides = [1, 1]} : vector<8x128xf32> to vector<8x32xf32>
    %215 = arith.negf %214 : vector<8x32xf32>
    %216 = math.exp %215 : vector<8x32xf32>
    %cst_55 = arith.constant 1.000000e+00 : f32
    %217 = vector.broadcast %cst_55 : f32 to vector<8x32xf32>
    %218 = arith.addf %217, %216 : vector<8x32xf32>
    %219 = arith.divf %217, %218 : vector<8x32xf32>
    %220 = vector.extract_strided_slice %213 {offsets = [0, 32], sizes = [8, 32], strides = [1, 1]} : vector<8x128xf32> to vector<8x32xf32>
    %221 = arith.negf %220 : vector<8x32xf32>
    %222 = math.exp %221 : vector<8x32xf32>
    %cst_56 = arith.constant 1.000000e+00 : f32
    %223 = vector.broadcast %cst_56 : f32 to vector<8x32xf32>
    %224 = arith.addf %223, %222 : vector<8x32xf32>
    %225 = arith.divf %223, %224 : vector<8x32xf32>
    %226 = vector.extract_strided_slice %213 {offsets = [0, 64], sizes = [8, 32], strides = [1, 1]} : vector<8x128xf32> to vector<8x32xf32>
    %227 = math.tanh %226 : vector<8x32xf32>
    %228 = vector.extract_strided_slice %213 {offsets = [0, 96], sizes = [8, 32], strides = [1, 1]} : vector<8x128xf32> to vector<8x32xf32>
    %229 = arith.negf %228 : vector<8x32xf32>
    %230 = math.exp %229 : vector<8x32xf32>
    %cst_57 = arith.constant 1.000000e+00 : f32
    %231 = vector.broadcast %cst_57 : f32 to vector<8x32xf32>
    %232 = arith.addf %231, %230 : vector<8x32xf32>
    %233 = arith.divf %231, %232 : vector<8x32xf32>
    %234 = arith.mulf %225, %203 : vector<8x32xf32>
    %235 = arith.mulf %219, %227 : vector<8x32xf32>
    %236 = arith.addf %234, %235 : vector<8x32xf32>
    %237 = math.tanh %236 : vector<8x32xf32>
    %238 = arith.mulf %233, %237 : vector<8x32xf32>
    %239 = arith.index_cast %209 : i32 to index
    %c0_58 = arith.constant 0 : index
    %240 = vector.load %arg14[%239, %c0_58] : memref<64x32xf32, #tpu.memory_space<vmem>>, vector<8x32xf32>
    tpu.vector_store %arg14[%239, %c0_58], %238 {strides = array<i32>} : memref<64x32xf32, #tpu.memory_space<vmem>>, vector<8x32xf32>,
    %c7_i32 = arith.constant 7 : i32
    %c8_i32_59 = arith.constant 8 : i32
    %241 = arith.muli %c7_i32, %c8_i32_59 : i32
    %242 = tpu.assume_multiple %241, 8 : i32
    %cst_60 = arith.constant dense<0.000000e+00> : vector<8x128xf32>
    %243 = tpu.matmul %238, %7, %cst_60 {dimension_numbers = #tpu.dot_dimension_numbers<[1], [0], [0], [1], [0, 0, 1, 1], [], []>} : vector<8x32xf32>, vector<32x128xf32>, vector<8x128xf32> -> vector<8x128xf32>
    %244 = arith.index_cast %242 : i32 to index
    %c0_61 = arith.constant 0 : index
    %245 = vector.load %arg15[%244, %c0_61] : memref<64x128xf32, #tpu.memory_space<vmem>>, vector<8x128xf32>
    %246 = arith.addf %243, %245 : vector<8x128xf32>
    %247 = vector.extract_strided_slice %246 {offsets = [0, 0], sizes = [8, 32], strides = [1, 1]} : vector<8x128xf32> to vector<8x32xf32>
    %248 = arith.negf %247 : vector<8x32xf32>
    %249 = math.exp %248 : vector<8x32xf32>
    %cst_62 = arith.constant 1.000000e+00 : f32
    %250 = vector.broadcast %cst_62 : f32 to vector<8x32xf32>
    %251 = arith.addf %250, %249 : vector<8x32xf32>
    %252 = arith.divf %250, %251 : vector<8x32xf32>
    %253 = vector.extract_strided_slice %246 {offsets = [0, 32], sizes = [8, 32], strides = [1, 1]} : vector<8x128xf32> to vector<8x32xf32>
    %254 = arith.negf %253 : vector<8x32xf32>
    %255 = math.exp %254 : vector<8x32xf32>
    %cst_63 = arith.constant 1.000000e+00 : f32
    %256 = vector.broadcast %cst_63 : f32 to vector<8x32xf32>
    %257 = arith.addf %256, %255 : vector<8x32xf32>
    %258 = arith.divf %256, %257 : vector<8x32xf32>
    %259 = vector.extract_strided_slice %246 {offsets = [0, 64], sizes = [8, 32], strides = [1, 1]} : vector<8x128xf32> to vector<8x32xf32>
    %260 = math.tanh %259 : vector<8x32xf32>
    %261 = vector.extract_strided_slice %246 {offsets = [0, 96], sizes = [8, 32], strides = [1, 1]} : vector<8x128xf32> to vector<8x32xf32>
    %262 = arith.negf %261 : vector<8x32xf32>
    %263 = math.exp %262 : vector<8x32xf32>
    %cst_64 = arith.constant 1.000000e+00 : f32
    %264 = vector.broadcast %cst_64 : f32 to vector<8x32xf32>
    %265 = arith.addf %264, %263 : vector<8x32xf32>
    %266 = arith.divf %264, %265 : vector<8x32xf32>
    %267 = arith.mulf %258, %236 : vector<8x32xf32>
    %268 = arith.mulf %252, %260 : vector<8x32xf32>
    %269 = arith.addf %267, %268 : vector<8x32xf32>
    %270 = math.tanh %269 : vector<8x32xf32>
    %271 = arith.mulf %266, %270 : vector<8x32xf32>
    %272 = arith.index_cast %242 : i32 to index
    %c0_65 = arith.constant 0 : index
    %273 = vector.load %arg14[%272, %c0_65] : memref<64x32xf32, #tpu.memory_space<vmem>>, vector<8x32xf32>
    tpu.vector_store %arg14[%272, %c0_65], %271 {strides = array<i32>} : memref<64x32xf32, #tpu.memory_space<vmem>>, vector<8x32xf32>,
    %c8_i32_66 = arith.constant 8 : i32
    %c0_67 = arith.constant 0 : index
    %c0_68 = arith.constant 0 : index
    %274 = vector.load %arg14[%c0_67, %c0_68] : memref<64x32xf32, #tpu.memory_space<vmem>>, vector<64x32xf32>
    %c0_69 = arith.constant 0 : index
    %c0_70 = arith.constant 0 : index
    %275 = vector.load %arg4[%c0_69, %c0_70] : memref<32x128xf32, #tpu.memory_space<vmem>>, vector<32x128xf32>
    %cst_71 = arith.constant dense<0.000000e+00> : vector<64x128xf32>
    %276 = tpu.matmul %274, %275, %cst_71 {dimension_numbers = #tpu.dot_dimension_numbers<[1], [0], [0], [1], [0, 0, 1, 1], [], []>} : vector<64x32xf32>, vector<32x128xf32>, vector<64x128xf32> -> vector<64x128xf32>
    %c0_72 = arith.constant 0 : index
    %c0_73 = arith.constant 0 : index
    %277 = vector.load %arg6[%c0_72, %c0_73] : memref<1x128xf32, #tpu.memory_space<vmem>>, vector<1x128xf32>
    %278 = vector.broadcast %277 : vector<1x128xf32> to vector<64x128xf32>
    %279 = arith.addf %276, %278 : vector<64x128xf32>
    %c0_74 = arith.constant 0 : index
    %c0_75 = arith.constant 0 : index
    %280 = vector.load %arg15[%c0_74, %c0_75] : memref<64x128xf32, #tpu.memory_space<vmem>>, vector<64x128xf32>
    tpu.vector_store %arg15[%c0_74, %c0_75], %279 {strides = array<i32>} : memref<64x128xf32, #tpu.memory_space<vmem>>, vector<64x128xf32>,
    %c0_76 = arith.constant 0 : index
    %c0_77 = arith.constant 0 : index
    %281 = vector.load %arg5[%c0_76, %c0_77] : memref<32x128xf32, #tpu.memory_space<vmem>>, vector<32x128xf32>
    %cst_78 = arith.constant 0.000000e+00 : f32
    %282 = vector.broadcast %cst_78 : f32 to vector<8x32xf32>
    %cst_79 = arith.constant 0.000000e+00 : f32
    %283 = vector.broadcast %cst_79 : f32 to vector<8x32xf32>
    %c0_i32_80 = arith.constant 0 : i32
    %c8_i32_81 = arith.constant 8 : i32
    %284 = arith.muli %c0_i32_80, %c8_i32_81 : i32
    %285 = tpu.assume_multiple %284, 8 : i32
    %cst_82 = arith.constant dense<0.000000e+00> : vector<8x128xf32>
    %286 = tpu.matmul %282, %281, %cst_82 {dimension_numbers = #tpu.dot_dimension_numbers<[1], [0], [0], [1], [0, 0, 1, 1], [], []>} : vector<8x32xf32>, vector<32x128xf32>, vector<8x128xf32> -> vector<8x128xf32>
    %287 = arith.index_cast %285 : i32 to index
    %c0_83 = arith.constant 0 : index
    %288 = vector.load %arg15[%287, %c0_83] : memref<64x128xf32, #tpu.memory_space<vmem>>, vector<8x128xf32>
    %289 = arith.addf %286, %288 : vector<8x128xf32>
    %290 = vector.extract_strided_slice %289 {offsets = [0, 0], sizes = [8, 32], strides = [1, 1]} : vector<8x128xf32> to vector<8x32xf32>
    %291 = arith.negf %290 : vector<8x32xf32>
    %292 = math.exp %291 : vector<8x32xf32>
    %cst_84 = arith.constant 1.000000e+00 : f32
    %293 = vector.broadcast %cst_84 : f32 to vector<8x32xf32>
    %294 = arith.addf %293, %292 : vector<8x32xf32>
    %295 = arith.divf %293, %294 : vector<8x32xf32>
    %296 = vector.extract_strided_slice %289 {offsets = [0, 32], sizes = [8, 32], strides = [1, 1]} : vector<8x128xf32> to vector<8x32xf32>
    %297 = arith.negf %296 : vector<8x32xf32>
    %298 = math.exp %297 : vector<8x32xf32>
    %cst_85 = arith.constant 1.000000e+00 : f32
    %299 = vector.broadcast %cst_85 : f32 to vector<8x32xf32>
    %300 = arith.addf %299, %298 : vector<8x32xf32>
    %301 = arith.divf %299, %300 : vector<8x32xf32>
    %302 = vector.extract_strided_slice %289 {offsets = [0, 64], sizes = [8, 32], strides = [1, 1]} : vector<8x128xf32> to vector<8x32xf32>
    %303 = math.tanh %302 : vector<8x32xf32>
    %304 = vector.extract_strided_slice %289 {offsets = [0, 96], sizes = [8, 32], strides = [1, 1]} : vector<8x128xf32> to vector<8x32xf32>
    %305 = arith.negf %304 : vector<8x32xf32>
    %306 = math.exp %305 : vector<8x32xf32>
    %cst_86 = arith.constant 1.000000e+00 : f32
    %307 = vector.broadcast %cst_86 : f32 to vector<8x32xf32>
    %308 = arith.addf %307, %306 : vector<8x32xf32>
    %309 = arith.divf %307, %308 : vector<8x32xf32>
    %310 = arith.mulf %301, %283 : vector<8x32xf32>
    %311 = arith.mulf %295, %303 : vector<8x32xf32>
    %312 = arith.addf %310, %311 : vector<8x32xf32>
    %313 = math.tanh %312 : vector<8x32xf32>
    %314 = arith.mulf %309, %313 : vector<8x32xf32>
    %c1_i32_87 = arith.constant 1 : i32
    %c8_i32_88 = arith.constant 8 : i32
    %315 = arith.muli %c1_i32_87, %c8_i32_88 : i32
    %316 = tpu.assume_multiple %315, 8 : i32
    %cst_89 = arith.constant dense<0.000000e+00> : vector<8x128xf32>
    %317 = tpu.matmul %314, %281, %cst_89 {dimension_numbers = #tpu.dot_dimension_numbers<[1], [0], [0], [1], [0, 0, 1, 1], [], []>} : vector<8x32xf32>, vector<32x128xf32>, vector<8x128xf32> -> vector<8x128xf32>
    %318 = arith.index_cast %316 : i32 to index
    %c0_90 = arith.constant 0 : index
    %319 = vector.load %arg15[%318, %c0_90] : memref<64x128xf32, #tpu.memory_space<vmem>>, vector<8x128xf32>
    %320 = arith.addf %317, %319 : vector<8x128xf32>
    %321 = vector.extract_strided_slice %320 {offsets = [0, 0], sizes = [8, 32], strides = [1, 1]} : vector<8x128xf32> to vector<8x32xf32>
    %322 = arith.negf %321 : vector<8x32xf32>
    %323 = math.exp %322 : vector<8x32xf32>
    %cst_91 = arith.constant 1.000000e+00 : f32
    %324 = vector.broadcast %cst_91 : f32 to vector<8x32xf32>
    %325 = arith.addf %324, %323 : vector<8x32xf32>
    %326 = arith.divf %324, %325 : vector<8x32xf32>
    %327 = vector.extract_strided_slice %320 {offsets = [0, 32], sizes = [8, 32], strides = [1, 1]} : vector<8x128xf32> to vector<8x32xf32>
    %328 = arith.negf %327 : vector<8x32xf32>
    %329 = math.exp %328 : vector<8x32xf32>
    %cst_92 = arith.constant 1.000000e+00 : f32
    %330 = vector.broadcast %cst_92 : f32 to vector<8x32xf32>
    %331 = arith.addf %330, %329 : vector<8x32xf32>
    %332 = arith.divf %330, %331 : vector<8x32xf32>
    %333 = vector.extract_strided_slice %320 {offsets = [0, 64], sizes = [8, 32], strides = [1, 1]} : vector<8x128xf32> to vector<8x32xf32>
    %334 = math.tanh %333 : vector<8x32xf32>
    %335 = vector.extract_strided_slice %320 {offsets = [0, 96], sizes = [8, 32], strides = [1, 1]} : vector<8x128xf32> to vector<8x32xf32>
    %336 = arith.negf %335 : vector<8x32xf32>
    %337 = math.exp %336 : vector<8x32xf32>
    %cst_93 = arith.constant 1.000000e+00 : f32
    %338 = vector.broadcast %cst_93 : f32 to vector<8x32xf32>
    %339 = arith.addf %338, %337 : vector<8x32xf32>
    %340 = arith.divf %338, %339 : vector<8x32xf32>
    %341 = arith.mulf %332, %312 : vector<8x32xf32>
    %342 = arith.mulf %326, %334 : vector<8x32xf32>
    %343 = arith.addf %341, %342 : vector<8x32xf32>
    %344 = math.tanh %343 : vector<8x32xf32>
    %345 = arith.mulf %340, %344 : vector<8x32xf32>
    %c2_i32_94 = arith.constant 2 : i32
    %c8_i32_95 = arith.constant 8 : i32
    %346 = arith.muli %c2_i32_94, %c8_i32_95 : i32
    %347 = tpu.assume_multiple %346, 8 : i32
    %cst_96 = arith.constant dense<0.000000e+00> : vector<8x128xf32>
    %348 = tpu.matmul %345, %281, %cst_96 {dimension_numbers = #tpu.dot_dimension_numbers<[1], [0], [0], [1], [0, 0, 1, 1], [], []>} : vector<8x32xf32>, vector<32x128xf32>, vector<8x128xf32> -> vector<8x128xf32>
    %349 = arith.index_cast %347 : i32 to index
    %c0_97 = arith.constant 0 : index
    %350 = vector.load %arg15[%349, %c0_97] : memref<64x128xf32, #tpu.memory_space<vmem>>, vector<8x128xf32>
    %351 = arith.addf %348, %350 : vector<8x128xf32>
    %352 = vector.extract_strided_slice %351 {offsets = [0, 0], sizes = [8, 32], strides = [1, 1]} : vector<8x128xf32> to vector<8x32xf32>
    %353 = arith.negf %352 : vector<8x32xf32>
    %354 = math.exp %353 : vector<8x32xf32>
    %cst_98 = arith.constant 1.000000e+00 : f32
    %355 = vector.broadcast %cst_98 : f32 to vector<8x32xf32>
    %356 = arith.addf %355, %354 : vector<8x32xf32>
    %357 = arith.divf %355, %356 : vector<8x32xf32>
    %358 = vector.extract_strided_slice %351 {offsets = [0, 32], sizes = [8, 32], strides = [1, 1]} : vector<8x128xf32> to vector<8x32xf32>
    %359 = arith.negf %358 : vector<8x32xf32>
    %360 = math.exp %359 : vector<8x32xf32>
    %cst_99 = arith.constant 1.000000e+00 : f32
    %361 = vector.broadcast %cst_99 : f32 to vector<8x32xf32>
    %362 = arith.addf %361, %360 : vector<8x32xf32>
    %363 = arith.divf %361, %362 : vector<8x32xf32>
    %364 = vector.extract_strided_slice %351 {offsets = [0, 64], sizes = [8, 32], strides = [1, 1]} : vector<8x128xf32> to vector<8x32xf32>
    %365 = math.tanh %364 : vector<8x32xf32>
    %366 = vector.extract_strided_slice %351 {offsets = [0, 96], sizes = [8, 32], strides = [1, 1]} : vector<8x128xf32> to vector<8x32xf32>
    %367 = arith.negf %366 : vector<8x32xf32>
    %368 = math.exp %367 : vector<8x32xf32>
    %cst_100 = arith.constant 1.000000e+00 : f32
    %369 = vector.broadcast %cst_100 : f32 to vector<8x32xf32>
    %370 = arith.addf %369, %368 : vector<8x32xf32>
    %371 = arith.divf %369, %370 : vector<8x32xf32>
    %372 = arith.mulf %363, %343 : vector<8x32xf32>
    %373 = arith.mulf %357, %365 : vector<8x32xf32>
    %374 = arith.addf %372, %373 : vector<8x32xf32>
    %375 = math.tanh %374 : vector<8x32xf32>
    %376 = arith.mulf %371, %375 : vector<8x32xf32>
    %c3_i32_101 = arith.constant 3 : i32
    %c8_i32_102 = arith.constant 8 : i32
    %377 = arith.muli %c3_i32_101, %c8_i32_102 : i32
    %378 = tpu.assume_multiple %377, 8 : i32
    %cst_103 = arith.constant dense<0.000000e+00> : vector<8x128xf32>
    %379 = tpu.matmul %376, %281, %cst_103 {dimension_numbers = #tpu.dot_dimension_numbers<[1], [0], [0], [1], [0, 0, 1, 1], [], []>} : vector<8x32xf32>, vector<32x128xf32>, vector<8x128xf32> -> vector<8x128xf32>
    %380 = arith.index_cast %378 : i32 to index
    %c0_104 = arith.constant 0 : index
    %381 = vector.load %arg15[%380, %c0_104] : memref<64x128xf32, #tpu.memory_space<vmem>>, vector<8x128xf32>
    %382 = arith.addf %379, %381 : vector<8x128xf32>
    %383 = vector.extract_strided_slice %382 {offsets = [0, 0], sizes = [8, 32], strides = [1, 1]} : vector<8x128xf32> to vector<8x32xf32>
    %384 = arith.negf %383 : vector<8x32xf32>
    %385 = math.exp %384 : vector<8x32xf32>
    %cst_105 = arith.constant 1.000000e+00 : f32
    %386 = vector.broadcast %cst_105 : f32 to vector<8x32xf32>
    %387 = arith.addf %386, %385 : vector<8x32xf32>
    %388 = arith.divf %386, %387 : vector<8x32xf32>
    %389 = vector.extract_strided_slice %382 {offsets = [0, 32], sizes = [8, 32], strides = [1, 1]} : vector<8x128xf32> to vector<8x32xf32>
    %390 = arith.negf %389 : vector<8x32xf32>
    %391 = math.exp %390 : vector<8x32xf32>
    %cst_106 = arith.constant 1.000000e+00 : f32
    %392 = vector.broadcast %cst_106 : f32 to vector<8x32xf32>
    %393 = arith.addf %392, %391 : vector<8x32xf32>
    %394 = arith.divf %392, %393 : vector<8x32xf32>
    %395 = vector.extract_strided_slice %382 {offsets = [0, 64], sizes = [8, 32], strides = [1, 1]} : vector<8x128xf32> to vector<8x32xf32>
    %396 = math.tanh %395 : vector<8x32xf32>
    %397 = vector.extract_strided_slice %382 {offsets = [0, 96], sizes = [8, 32], strides = [1, 1]} : vector<8x128xf32> to vector<8x32xf32>
    %398 = arith.negf %397 : vector<8x32xf32>
    %399 = math.exp %398 : vector<8x32xf32>
    %cst_107 = arith.constant 1.000000e+00 : f32
    %400 = vector.broadcast %cst_107 : f32 to vector<8x32xf32>
    %401 = arith.addf %400, %399 : vector<8x32xf32>
    %402 = arith.divf %400, %401 : vector<8x32xf32>
    %403 = arith.mulf %394, %374 : vector<8x32xf32>
    %404 = arith.mulf %388, %396 : vector<8x32xf32>
    %405 = arith.addf %403, %404 : vector<8x32xf32>
    %406 = math.tanh %405 : vector<8x32xf32>
    %407 = arith.mulf %402, %406 : vector<8x32xf32>
    %c4_i32_108 = arith.constant 4 : i32
    %c8_i32_109 = arith.constant 8 : i32
    %408 = arith.muli %c4_i32_108, %c8_i32_109 : i32
    %409 = tpu.assume_multiple %408, 8 : i32
    %cst_110 = arith.constant dense<0.000000e+00> : vector<8x128xf32>
    %410 = tpu.matmul %407, %281, %cst_110 {dimension_numbers = #tpu.dot_dimension_numbers<[1], [0], [0], [1], [0, 0, 1, 1], [], []>} : vector<8x32xf32>, vector<32x128xf32>, vector<8x128xf32> -> vector<8x128xf32>
    %411 = arith.index_cast %409 : i32 to index
    %c0_111 = arith.constant 0 : index
    %412 = vector.load %arg15[%411, %c0_111] : memref<64x128xf32, #tpu.memory_space<vmem>>, vector<8x128xf32>
    %413 = arith.addf %410, %412 : vector<8x128xf32>
    %414 = vector.extract_strided_slice %413 {offsets = [0, 0], sizes = [8, 32], strides = [1, 1]} : vector<8x128xf32> to vector<8x32xf32>
    %415 = arith.negf %414 : vector<8x32xf32>
    %416 = math.exp %415 : vector<8x32xf32>
    %cst_112 = arith.constant 1.000000e+00 : f32
    %417 = vector.broadcast %cst_112 : f32 to vector<8x32xf32>
    %418 = arith.addf %417, %416 : vector<8x32xf32>
    %419 = arith.divf %417, %418 : vector<8x32xf32>
    %420 = vector.extract_strided_slice %413 {offsets = [0, 32], sizes = [8, 32], strides = [1, 1]} : vector<8x128xf32> to vector<8x32xf32>
    %421 = arith.negf %420 : vector<8x32xf32>
    %422 = math.exp %421 : vector<8x32xf32>
    %cst_113 = arith.constant 1.000000e+00 : f32
    %423 = vector.broadcast %cst_113 : f32 to vector<8x32xf32>
    %424 = arith.addf %423, %422 : vector<8x32xf32>
    %425 = arith.divf %423, %424 : vector<8x32xf32>
    %426 = vector.extract_strided_slice %413 {offsets = [0, 64], sizes = [8, 32], strides = [1, 1]} : vector<8x128xf32> to vector<8x32xf32>
    %427 = math.tanh %426 : vector<8x32xf32>
    %428 = vector.extract_strided_slice %413 {offsets = [0, 96], sizes = [8, 32], strides = [1, 1]} : vector<8x128xf32> to vector<8x32xf32>
    %429 = arith.negf %428 : vector<8x32xf32>
    %430 = math.exp %429 : vector<8x32xf32>
    %cst_114 = arith.constant 1.000000e+00 : f32
    %431 = vector.broadcast %cst_114 : f32 to vector<8x32xf32>
    %432 = arith.addf %431, %430 : vector<8x32xf32>
    %433 = arith.divf %431, %432 : vector<8x32xf32>
    %434 = arith.mulf %425, %405 : vector<8x32xf32>
    %435 = arith.mulf %419, %427 : vector<8x32xf32>
    %436 = arith.addf %434, %435 : vector<8x32xf32>
    %437 = math.tanh %436 : vector<8x32xf32>
    %438 = arith.mulf %433, %437 : vector<8x32xf32>
    %c5_i32_115 = arith.constant 5 : i32
    %c8_i32_116 = arith.constant 8 : i32
    %439 = arith.muli %c5_i32_115, %c8_i32_116 : i32
    %440 = tpu.assume_multiple %439, 8 : i32
    %cst_117 = arith.constant dense<0.000000e+00> : vector<8x128xf32>
    %441 = tpu.matmul %438, %281, %cst_117 {dimension_numbers = #tpu.dot_dimension_numbers<[1], [0], [0], [1], [0, 0, 1, 1], [], []>} : vector<8x32xf32>, vector<32x128xf32>, vector<8x128xf32> -> vector<8x128xf32>
    %442 = arith.index_cast %440 : i32 to index
    %c0_118 = arith.constant 0 : index
    %443 = vector.load %arg15[%442, %c0_118] : memref<64x128xf32, #tpu.memory_space<vmem>>, vector<8x128xf32>
    %444 = arith.addf %441, %443 : vector<8x128xf32>
    %445 = vector.extract_strided_slice %444 {offsets = [0, 0], sizes = [8, 32], strides = [1, 1]} : vector<8x128xf32> to vector<8x32xf32>
    %446 = arith.negf %445 : vector<8x32xf32>
    %447 = math.exp %446 : vector<8x32xf32>
    %cst_119 = arith.constant 1.000000e+00 : f32
    %448 = vector.broadcast %cst_119 : f32 to vector<8x32xf32>
    %449 = arith.addf %448, %447 : vector<8x32xf32>
    %450 = arith.divf %448, %449 : vector<8x32xf32>
    %451 = vector.extract_strided_slice %444 {offsets = [0, 32], sizes = [8, 32], strides = [1, 1]} : vector<8x128xf32> to vector<8x32xf32>
    %452 = arith.negf %451 : vector<8x32xf32>
    %453 = math.exp %452 : vector<8x32xf32>
    %cst_120 = arith.constant 1.000000e+00 : f32
    %454 = vector.broadcast %cst_120 : f32 to vector<8x32xf32>
    %455 = arith.addf %454, %453 : vector<8x32xf32>
    %456 = arith.divf %454, %455 : vector<8x32xf32>
    %457 = vector.extract_strided_slice %444 {offsets = [0, 64], sizes = [8, 32], strides = [1, 1]} : vector<8x128xf32> to vector<8x32xf32>
    %458 = math.tanh %457 : vector<8x32xf32>
    %459 = vector.extract_strided_slice %444 {offsets = [0, 96], sizes = [8, 32], strides = [1, 1]} : vector<8x128xf32> to vector<8x32xf32>
    %460 = arith.negf %459 : vector<8x32xf32>
    %461 = math.exp %460 : vector<8x32xf32>
    %cst_121 = arith.constant 1.000000e+00 : f32
    %462 = vector.broadcast %cst_121 : f32 to vector<8x32xf32>
    %463 = arith.addf %462, %461 : vector<8x32xf32>
    %464 = arith.divf %462, %463 : vector<8x32xf32>
    %465 = arith.mulf %456, %436 : vector<8x32xf32>
    %466 = arith.mulf %450, %458 : vector<8x32xf32>
    %467 = arith.addf %465, %466 : vector<8x32xf32>
    %468 = math.tanh %467 : vector<8x32xf32>
    %469 = arith.mulf %464, %468 : vector<8x32xf32>
    %c6_i32_122 = arith.constant 6 : i32
    %c8_i32_123 = arith.constant 8 : i32
    %470 = arith.muli %c6_i32_122, %c8_i32_123 : i32
    %471 = tpu.assume_multiple %470, 8 : i32
    %cst_124 = arith.constant dense<0.000000e+00> : vector<8x128xf32>
    %472 = tpu.matmul %469, %281, %cst_124 {dimension_numbers = #tpu.dot_dimension_numbers<[1], [0], [0], [1], [0, 0, 1, 1], [], []>} : vector<8x32xf32>, vector<32x128xf32>, vector<8x128xf32> -> vector<8x128xf32>
    %473 = arith.index_cast %471 : i32 to index
    %c0_125 = arith.constant 0 : index
    %474 = vector.load %arg15[%473, %c0_125] : memref<64x128xf32, #tpu.memory_space<vmem>>, vector<8x128xf32>
    %475 = arith.addf %472, %474 : vector<8x128xf32>
    %476 = vector.extract_strided_slice %475 {offsets = [0, 0], sizes = [8, 32], strides = [1, 1]} : vector<8x128xf32> to vector<8x32xf32>
    %477 = arith.negf %476 : vector<8x32xf32>
    %478 = math.exp %477 : vector<8x32xf32>
    %cst_126 = arith.constant 1.000000e+00 : f32
    %479 = vector.broadcast %cst_126 : f32 to vector<8x32xf32>
    %480 = arith.addf %479, %478 : vector<8x32xf32>
    %481 = arith.divf %479, %480 : vector<8x32xf32>
    %482 = vector.extract_strided_slice %475 {offsets = [0, 32], sizes = [8, 32], strides = [1, 1]} : vector<8x128xf32> to vector<8x32xf32>
    %483 = arith.negf %482 : vector<8x32xf32>
    %484 = math.exp %483 : vector<8x32xf32>
    %cst_127 = arith.constant 1.000000e+00 : f32
    %485 = vector.broadcast %cst_127 : f32 to vector<8x32xf32>
    %486 = arith.addf %485, %484 : vector<8x32xf32>
    %487 = arith.divf %485, %486 : vector<8x32xf32>
    %488 = vector.extract_strided_slice %475 {offsets = [0, 64], sizes = [8, 32], strides = [1, 1]} : vector<8x128xf32> to vector<8x32xf32>
    %489 = math.tanh %488 : vector<8x32xf32>
    %490 = vector.extract_strided_slice %475 {offsets = [0, 96], sizes = [8, 32], strides = [1, 1]} : vector<8x128xf32> to vector<8x32xf32>
    %491 = arith.negf %490 : vector<8x32xf32>
    %492 = math.exp %491 : vector<8x32xf32>
    %cst_128 = arith.constant 1.000000e+00 : f32
    %493 = vector.broadcast %cst_128 : f32 to vector<8x32xf32>
    %494 = arith.addf %493, %492 : vector<8x32xf32>
    %495 = arith.divf %493, %494 : vector<8x32xf32>
    %496 = arith.mulf %487, %467 : vector<8x32xf32>
    %497 = arith.mulf %481, %489 : vector<8x32xf32>
    %498 = arith.addf %496, %497 : vector<8x32xf32>
    %499 = math.tanh %498 : vector<8x32xf32>
    %500 = arith.mulf %495, %499 : vector<8x32xf32>
    %c7_i32_129 = arith.constant 7 : i32
    %c8_i32_130 = arith.constant 8 : i32
    %501 = arith.muli %c7_i32_129, %c8_i32_130 : i32
    %502 = tpu.assume_multiple %501, 8 : i32
    %cst_131 = arith.constant dense<0.000000e+00> : vector<8x128xf32>
    %503 = tpu.matmul %500, %281, %cst_131 {dimension_numbers = #tpu.dot_dimension_numbers<[1], [0], [0], [1], [0, 0, 1, 1], [], []>} : vector<8x32xf32>, vector<32x128xf32>, vector<8x128xf32> -> vector<8x128xf32>
    %504 = arith.index_cast %502 : i32 to index
    %c0_132 = arith.constant 0 : index
    %505 = vector.load %arg15[%504, %c0_132] : memref<64x128xf32, #tpu.memory_space<vmem>>, vector<8x128xf32>
    %506 = arith.addf %503, %505 : vector<8x128xf32>
    %507 = vector.extract_strided_slice %506 {offsets = [0, 0], sizes = [8, 32], strides = [1, 1]} : vector<8x128xf32> to vector<8x32xf32>
    %508 = arith.negf %507 : vector<8x32xf32>
    %509 = math.exp %508 : vector<8x32xf32>
    %cst_133 = arith.constant 1.000000e+00 : f32
    %510 = vector.broadcast %cst_133 : f32 to vector<8x32xf32>
    %511 = arith.addf %510, %509 : vector<8x32xf32>
    %512 = arith.divf %510, %511 : vector<8x32xf32>
    %513 = vector.extract_strided_slice %506 {offsets = [0, 32], sizes = [8, 32], strides = [1, 1]} : vector<8x128xf32> to vector<8x32xf32>
    %514 = arith.negf %513 : vector<8x32xf32>
    %515 = math.exp %514 : vector<8x32xf32>
    %cst_134 = arith.constant 1.000000e+00 : f32
    %516 = vector.broadcast %cst_134 : f32 to vector<8x32xf32>
    %517 = arith.addf %516, %515 : vector<8x32xf32>
    %518 = arith.divf %516, %517 : vector<8x32xf32>
    %519 = vector.extract_strided_slice %506 {offsets = [0, 64], sizes = [8, 32], strides = [1, 1]} : vector<8x128xf32> to vector<8x32xf32>
    %520 = math.tanh %519 : vector<8x32xf32>
    %521 = vector.extract_strided_slice %506 {offsets = [0, 96], sizes = [8, 32], strides = [1, 1]} : vector<8x128xf32> to vector<8x32xf32>
    %522 = arith.negf %521 : vector<8x32xf32>
    %523 = math.exp %522 : vector<8x32xf32>
    %cst_135 = arith.constant 1.000000e+00 : f32
    %524 = vector.broadcast %cst_135 : f32 to vector<8x32xf32>
    %525 = arith.addf %524, %523 : vector<8x32xf32>
    %526 = arith.divf %524, %525 : vector<8x32xf32>
    %527 = arith.mulf %518, %498 : vector<8x32xf32>
    %528 = arith.mulf %512, %520 : vector<8x32xf32>
    %529 = arith.addf %527, %528 : vector<8x32xf32>
    %530 = math.tanh %529 : vector<8x32xf32>
    %531 = arith.mulf %526, %530 : vector<8x32xf32>
    %c8_i32_136 = arith.constant 8 : i32
    %c0_137 = arith.constant 0 : index
    %c0_138 = arith.constant 0 : index
    %532 = vector.load %arg7[%c0_137, %c0_138] : memref<32x32xf32, #tpu.memory_space<vmem>>, vector<32x32xf32>
    %cst_139 = arith.constant dense<0.000000e+00> : vector<8x32xf32>
    %533 = tpu.matmul %531, %532, %cst_139 {dimension_numbers = #tpu.dot_dimension_numbers<[1], [0], [0], [1], [0, 0, 1, 1], [], []>} : vector<8x32xf32>, vector<32x32xf32>, vector<8x32xf32> -> vector<8x32xf32>
    %c0_140 = arith.constant 0 : index
    %c0_141 = arith.constant 0 : index
    %534 = vector.load %arg8[%c0_140, %c0_141] : memref<1x32xf32, #tpu.memory_space<vmem>>, vector<1x32xf32>
    %535 = vector.broadcast %534 : vector<1x32xf32> to vector<8x32xf32>
    %536 = arith.addf %533, %535 : vector<8x32xf32>
    %cst_142 = arith.constant 0.000000e+00 : f32
    %537 = vector.broadcast %cst_142 : f32 to vector<8x32xf32>
    %538 = arith.maximumf %536, %537 : vector<8x32xf32>
    %c0_143 = arith.constant 0 : index
    %c0_144 = arith.constant 0 : index
    %539 = vector.load %arg9[%c0_143, %c0_144] : memref<32x32xf32, #tpu.memory_space<vmem>>, vector<32x32xf32>
    %cst_145 = arith.constant dense<0.000000e+00> : vector<8x32xf32>
    %540 = tpu.matmul %538, %539, %cst_145 {dimension_numbers = #tpu.dot_dimension_numbers<[1], [0], [0], [1], [0, 0, 1, 1], [], []>} : vector<8x32xf32>, vector<32x32xf32>, vector<8x32xf32> -> vector<8x32xf32>
    %c0_146 = arith.constant 0 : index
    %c0_147 = arith.constant 0 : index
    %541 = vector.load %arg10[%c0_146, %c0_147] : memref<1x32xf32, #tpu.memory_space<vmem>>, vector<1x32xf32>
    %542 = vector.broadcast %541 : vector<1x32xf32> to vector<8x32xf32>
    %543 = arith.addf %540, %542 : vector<8x32xf32>
    %cst_148 = arith.constant 0.000000e+00 : f32
    %544 = vector.broadcast %cst_148 : f32 to vector<8x32xf32>
    %545 = arith.maximumf %543, %544 : vector<8x32xf32>
    %c0_149 = arith.constant 0 : index
    %c0_150 = arith.constant 0 : index
    %546 = vector.load %arg11[%c0_149, %c0_150] : memref<32x45xf32, #tpu.memory_space<vmem>>, vector<32x45xf32>
    %cst_151 = arith.constant dense<0.000000e+00> : vector<8x45xf32>
    %547 = tpu.matmul %545, %546, %cst_151 {dimension_numbers = #tpu.dot_dimension_numbers<[1], [0], [0], [1], [0, 0, 1, 1], [], []>} : vector<8x32xf32>, vector<32x45xf32>, vector<8x45xf32> -> vector<8x45xf32>
    %c0_152 = arith.constant 0 : index
    %c0_153 = arith.constant 0 : index
    %548 = vector.load %arg12[%c0_152, %c0_153] : memref<1x45xf32, #tpu.memory_space<vmem>>, vector<1x45xf32>
    %549 = vector.broadcast %548 : vector<1x45xf32> to vector<8x45xf32>
    %550 = arith.addf %547, %549 : vector<8x45xf32>
    %c0_154 = arith.constant 0 : index
    %c0_155 = arith.constant 0 : index
    %551 = vector.load %arg13[%c0_154, %c0_155] : memref<8x45xf32, #tpu.memory_space<vmem>>, vector<8x45xf32>
    tpu.vector_store %arg13[%c0_154, %c0_155], %550 {strides = array<i32>} : memref<8x45xf32, #tpu.memory_space<vmem>>, vector<8x45xf32>,
    return
  }
}

</mosaic_0001>

<bundles_post_ra>
// kernel: deep_lstm_net.1
= control target key start
LH: loop header
LB: loop body
LE: loop exit
PB: predicated region body
PF: predicated region fallthrough
CT: control target
= control target key end

     0   :  { %18 = vsyncpa [#allocation5], 0  ;;  %s3539_s0 = inlined_call_operand.vmem [shape: f32[64,16], index: 0, kind: input, shape index: {}]   ;;  %s3540_s1 = inlined_call_operand.vmem [shape: f32[16,128], index: 1, kind: input, shape index: {}]   ;;  %s3541_s2 = inlined_call_operand.vmem [shape: f32[32,128], index: 2, kind: input, shape index: {}]   ;;  %s3542_s3 = inlined_call_operand.vmem [shape: f32[1,128], index: 3, kind: input, shape index: {}]   ;;  %s3543_s4 = inlined_call_operand.vmem [shape: f32[32,128], index: 4, kind: input, shape index: {}]   ;;  %s3544_s5 = inlined_call_operand.vmem [shape: f32[32,128], index: 5, kind: input, shape index: {}]   ;;  %s3545_s6 = inlined_call_operand.vmem [shape: f32[1,128], index: 6, kind: input, shape index: {}]   ;;  %s3546_s7 = inlined_call_operand.vmem [shape: f32[32,32], index: 7, kind: input, shape index: {}]   ;;  %s3547_s8 = inlined_call_operand.hbm [shape: f32[1,32], index: 8, kind: input, shape index: {}]   ;;  %s3548_s9 = inlined_call_operand.vmem [shape: f32[32,32], index: 9, kind: input, shape index: {}]   ;;  %s3549_s10 = inlined_call_operand.hbm [shape: f32[1,32], index: 10, kind: input, shape index: {}]   ;;  %s3550_s11 = inlined_call_operand.hbm [shape: f32[32,45], index: 11, kind: input, shape index: {}]   ;;  %s3551_s12 = inlined_call_operand.vmem [shape: f32[1,45], index: 12, kind: input, shape index: {}]   ;;  %s3552_s13 = inlined_call_operand.vmem [shape: f32[8,45], index: 13, kind: output, shape index: {}]  }
   0x1   :  { %19 = vsyncpa [#allocation7], 0  ;;  %s3041_s25 = smov [#allocation6]   ;;  %s3042_s27 = smov [#allocation4]  }
   0x2   :  { %s54_s26 = sshll.u32 %s3041_s25, 4  ;;  %s42_s28 = sshll.u32 %s3042_s27, 4  ;;  %s55_s26 = int_to_ptr.vmem [resolvable:$true] %s54_s26  ;;  %s43_s28 = int_to_ptr.vmem [resolvable:$true] %s42_s28 }
   0x3   :  { %s2971_s14 = scalar_lea.hbm %s3549_s10, 16 }
   0x4   :  { %p2972_p0 = scmp.ne.s32.totalorder %s3549_s10, %s2971_s14  ;;  %p2975_p1 = scmp.lt.u32.totalorder %s2971_s14, %s3549_s10 }
   0x6   :  { %p2977_p2 = pnand %p2975_p1, %p2972_p0 }
   0x8   :  { %2980 = shalt.err (!%p2977_p2)
}
   0x9   :  { %s2981_s19 = scalar_lea.vmem %s55_s26, 16  ;;  %s2985_s20 = scalar_lea.vmem %s55_s26, 32 }
   0xa   :  { %p2982_p3 = scmp.ne.s32.totalorder %s55_s26, %s2981_s19  ;;  %p2986_p4 = scmp.lt.s32.totalorder %s55_s26, %s55_s26 }
   0xb   :  { %p2987_p5 = scmp.lt.s32.totalorder %s2985_s20, %s2981_s19 }
   0xd   :  { %p2988_p6 = por %p2987_p5, %p2986_p4 }
   0xf   :  { %p2989_p7 = pnand %p2988_p6, %p2982_p3 }
  0x11   :  { %2992 = shalt.err (!%p2989_p7)
}
  0x12   :  { %57 = dma.hbm_to_vmem [thread:$0]  %s3549_s10, 16, %s55_s26, [#allocation7]  }
  0x13   :  { %s2993_s25 = scalar_lea.hbm %s3547_s8, 16 }
  0x14   :  { %p2994_p8 = scmp.ne.s32.totalorder %s3547_s8, %s2993_s25  ;;  %p2997_p9 = scmp.lt.u32.totalorder %s2993_s25, %s3547_s8 }
  0x16   :  { %p2999_p10 = pnand %p2997_p9, %p2994_p8 }
  0x18   :  { %3002 = shalt.err (!%p2999_p10)
}
  0x19   :  { %s3003_s15 = scalar_lea.vmem %s43_s28, 16  ;;  %s3007_s16 = scalar_lea.vmem %s43_s28, 32 }
  0x1a   :  { %p3004_p11 = scmp.ne.s32.totalorder %s43_s28, %s3003_s15  ;;  %p3008_p12 = scmp.lt.s32.totalorder %s43_s28, %s43_s28 }
  0x1b   :  { %p3009_p13 = scmp.lt.s32.totalorder %s3007_s16, %s3003_s15 }
  0x1d   :  { %p3010_p0 = por %p3009_p13, %p3008_p12 }
  0x1f   :  { %p3011_p1 = pnand %p3010_p0, %p3004_p11 }
  0x21   :  { %3014 = shalt.err (!%p3011_p1)
}
  0x22   :  { %45 = dma.hbm_to_vmem [thread:$0]  %s3547_s8, 16, %s43_s28, [#allocation5]  }
  0x23   :  { %s3043_s17 = smov [#allocation8]   ;;  %s3015_s21 = scalar_lea.hbm %s3550_s11, 512 }
  0x24   :  { %s63_s18 = sshll.u32 %s3043_s17, 4  ;;  %p3016_p2 = scmp.ne.s32.totalorder %s3550_s11, %s3015_s21  ;;  %s64_s18 = int_to_ptr.vmem [resolvable:$true] %s63_s18 }
  0x25   :  { %p3019_p3 = scmp.lt.u32.totalorder %s3015_s21, %s3550_s11 }
  0x27   :  { %p3021_p4 = pnand %p3019_p3, %p3016_p2 }
  0x29   :  { %3024 = shalt.err (!%p3021_p4)
}
  0x2a   :  { %s3025_s27 = scalar_lea.vmem %s64_s18, 512  ;;  %p3030_p6 = scmp.lt.s32.totalorder %s64_s18, %s64_s18 }
  0x2b   :  { %p3026_p5 = scmp.ne.s32.totalorder %s64_s18, %s3025_s27  ;;  %p3031_p7 = scmp.lt.s32.totalorder %s3025_s27, %s3025_s27 }
  0x2d   :  { %p3032_p8 = por %p3031_p7, %p3030_p6 }
  0x2f   :  { %p3033_p9 = pnand %p3032_p8, %p3026_p5 }
  0x31   :  { %3036 = shalt.err (!%p3033_p9)
}
  0x32   :  { %s3044_s8 = smov 128   ;;  %s3045_s28 = smov 8  }
  0x33   :  { %69 = dma.hbm_to_vmem [thread:$0]  %s3550_s11, 512, %s64_s18, [#allocation7], %s3044_s8, %s3044_s8, %s3045_s28  }
  0x34   :  { %3037 = dma.done.wait [#allocation5], 16  }
  0x35   :  { %3038 = vsyncadd [#allocation5], 4294967280 }
  0x36   :  { %3039 = dma.done.wait [#allocation7], 528  }
  0x37   :  { %3040 = vsyncadd [#allocation7], 4294966768  ;;  %v3046_v0 = vmov 0.0|0.0   ;;  %vm3047_vm0 = vmmov 0   ;;  %v3048_v1 = vmov 0.0   ;;  %vm98_vm1 = vcmask 130048  }
  0x38   :  { %2711 = vmatprep.subr.bf16.mxu1 %v3046_v0  ;;  %2486 = vmatprep.mubr.msk.f32.mxu1 %vm3047_vm0, %v3048_v1  ;;  %v89_v2 = vld [vmem:[%s3540_s1] sm:$0xff]  ;;  %v90_v3 = vld [vmem:[%s3540_s1 + $0x8] sm:$0xff]  ;;  %v238_v9 = vld [vmem:[%s3541_s2 + $0x10] sm:$0xff]  ;;  %s3049_s8 = smov 64   ;;  %vm241_vm2 = vcmask 261120   ;;  %vm2283_vm3 = vcmask 367616  }
  0x39   :  { %v236_v4 = vld [vmem:[%s3541_s2] sm:$0xff]  ;;  %v2707_v5 = vpack.c.bf16 %v90_v3, %v89_v2  ;;  %v237_v6 = vld [vmem:[%s3541_s2 + $0x8] sm:$0xff]  ;;  %v239_v10 = vld [vmem:[%s3541_s2 + $0x18] sm:$0xff] }
  0x3a   :  { %v81_v7 = vld [vmem:[%s3539_s0] sm:$0xff]  ;;  %v3175_v8 = vpack.c.bf16 %v237_v6, %v236_v4  ;;  %v82_v11 = vld [vmem:[%s3539_s0 + $0x8] sm:$0xff]  ;;  %v3188_v12 = vpack.c.bf16 %v239_v10, %v238_v9  ;;  %v83_v48 = vld [vmem:[%s3539_s0 + $0x10] sm:$0xff] }
  0x3b   :  { %2466 = vmatprep.mubr.msk.f32.mxu0 %vm98_vm1, %v81_v7  ;;  %2708 = vmatprep.subr.bf16.mxu0 %v2707_v5  ;;  %v3209_v13 = vld [vmem:[%s3542_s3] ss:$0 sm:$0xff]  ;;  %s3050_s3 = smov 32   ;;  %v84_v49 = vld [vmem:[%s3539_s0 + $0x18] sm:$0xff]  ;;  %v86_v51 = vld [vmem:[%s3539_s0 + $0x28] sm:$0xff] }
  0x3c   :  { %2713 = vmatpush3.bf16.msra.mxu1 %v3175_v8  ;;  %2710 = vmatpush3.bf16.msra.mxu0 %v2707_v5  ;;  %v85_v50 = vld [vmem:[%s3539_s0 + $0x20] sm:$0xff]  ;;  %v87_v52 = vld [vmem:[%s3539_s0 + $0x30] sm:$0xff]  ;;  %v88_v53 = vld [vmem:[%s3539_s0 + $0x38] sm:$0xff] }
  0x3d   :  { %2714 = vmatprep.subr.bf16.mxu1 %v3046_v0  ;;  %2723 = vmatprep.subr.bf16.mxu0 %v3046_v0 }
  0x3f   :  { %2467 = vmatmul.mubr.msk.f32.vlgmr.msra.gmra.mrb[0].mxu0 %vm98_vm1, %v82_v11 }
  0x40   :  { %2716 = vmatpush3.bf16.msra.mxu1 %v3188_v12  ;;  %2725 = vmatpush3.bf16.msra.mxu0 %v3175_v8 }
  0x41   :  { %2717 = vmatprep.subr.bf16.mxu1 %v3046_v0  ;;  %2726 = vmatprep.subr.bf16.mxu0 %v3046_v0 }
  0x42   :  { %2469 = vmatprep.mubr.msk.f32.mxu0 %vm98_vm1, %v83_v48 }
  0x43   :  { %2487 = vmatmul.mubr.f32.vlgmr.msra.gmra.mrb[0].mxu1 %v3048_v1  ;;  %2470 = vmatmul.mubr.msk.f32.gmra.mrb[2].mxu0 %vm98_vm1, %v84_v49 }
  0x44   :  { %2719 = vmatpush3.bf16.msra.mxu1 %v3175_v8  ;;  %2497 = vmatprep.mubr.msk.f32.mxu1 %vm3047_vm0, %v3048_v1 }
  0x45   :  { %2720 = vmatprep.subr.bf16.mxu1 %v3046_v0  ;;  %2728 = vmatpush3.bf16.msra.mxu0 %v3188_v12 }
  0x46   :  { %2735 = vmatprep.subr.bf16.mxu0 %v3046_v0  ;;  %2472 = vmatprep.mubr.msk.f32.mxu0 %vm98_vm1, %v85_v50 }
  0x47   :  { %2473 = vmatmul.mubr.msk.f32.gmra.mrb[4].mxu0 %vm98_vm1, %v86_v51 }
  0x48   :  { %2722 = vmatpush3.bf16.msra.mxu1 %v3188_v12  ;;  %2475 = vmatprep.mubr.msk.f32.mxu0 %vm98_vm1, %v87_v52 }
  0x49   :  { %2729 = vmatprep.subr.bf16.mxu1 %v3046_v0 }
  0x4b   :  { %2476 = vmatmul.mubr.msk.f32.gmra.mrb[6].mxu0 %vm98_vm1, %v88_v53 }
  0x4c   :  { %2508 = vmatprep.mubr.msk.f32.mxu0 %vm3047_vm0, %v3048_v1 }
 0x112   :  { %v2468_v14 = vpop.f32.mrb[0].mxu0 }
 0x113   :  { %v189_v15 = vpop.f32.mrb[1].mxu0  ;;  %v195_v34 = vadd.f32 %v2468_v14, %v3209_v13 }
 0x114   :  { %v190_v16 = vadd.f32 %v3209_v13, %v189_v15 }
 0x116   :  { %v311_v17 = vpop.f32.mrb[0].mxu1  ;;  %v2471_v57 = vpop.f32.mrb[2].mxu0 }
 0x117   :  { %v312_v18 = vadd.f32 %v311_v17, %v190_v16  ;;  %v2488_v19 = vpop.f32.mrb[1].mxu1  ;;  %v199_v58 = vpop.f32.mrb[3].mxu0 }
 0x118   :  { %v200_v2 = vadd.f32 %v3209_v13, %v199_v58 }
 0x119   :  { %2843 = vtanh.f32 %v312_v18  ;;  %v2300_v21 = vmul.f32 -1.442695, %v312_v18 }
 0x11a   :  { %v3255_v59 = vpop.f32.mrb[4].mxu0 }
 0x11b   :  { %2845 = vpow2.f32 %v2300_v21  ;;  %v3257_v60 = vpop.f32.mrb[5].mxu0 }
 0x11e   :  { %v3259_v61 = vpop.f32.mrb[6].mxu0 }
 0x11f   :  { %v3261_v62 = vpop.f32.mrb[7].mxu0 }
 0x123   :  { %v2844_v20 = vpop.eup %2843 }
 0x124   :  { %324 = vrot.lane.b32.xlu0 %v2844_v20, %s3049_s8 }
 0x125   :  { %v2846_v22 = vpop.eup %2845 }
 0x126   :  { %v318_v23 = vadd.f32 1.0, %v2846_v22 }
 0x128   :  { %2847 = vrcp.f32 %v318_v23  ;;  %v205_v23 = vadd.f32 %v2471_v57, %v3209_v13 }
 0x132   :  { %v2848_v24 = vpop.eup %2847 }
 0x133   :  { %v322_v27 = vmul.f32 0.0, %v2848_v24 }
 0x196   :  { %v325_v25 = vpop.permute.xlu0 %324 }
 0x197   :  { %v327_v26 = vmul.f32 %v2848_v24, %v325_v25 }
 0x199   :  { %329 = vrot.lane.b32.xlu0 %v327_v26, %s3050_s3 }
 0x20b   :  { %v330_v28 = vpop.permute.xlu0 %329 }
 0x20c   :  { %v332_v29 = vadd.f32 %v330_v28, %v322_v27 }
 0x20e   :  { %2849 = vtanh.f32 %v332_v29 }
 0x218   :  { %v2850_v30 = vpop.eup %2849 }
 0x219   :  { %335 = vrot.lane.b32.xlu1 %v2850_v30, %s3049_s8 }
 0x28b   :  { %v336_v31 = vpop.permute.xlu1 %335 }
 0x28c   :  { %v338_v32 = vmul.f32 %v2848_v24, %v336_v31 }
 0x28e   :  { %340 = vrot.lane.b32.xlu1 %v338_v32, %s3050_s3 }
 0x300   :  { %v341_v33 = vpop.permute.xlu1 %340 }
 0x301   :  { %343 = vst.msk [vmem:[#allocation2] sm:$0xff] %vm241_vm2, %v341_v33  ;;  %2498 = vmatmul.mubr.msk.f32.vlgmr.msra.gmra.mrb[2].mxu1 %vm241_vm2, %v341_v33 }
 0x302   :  { %2731 = vmatpush3.bf16.msra.mxu1 %v3175_v8  ;;  %2519 = vmatprep.mubr.msk.f32.mxu1 %vm3047_vm0, %v3048_v1 }
 0x303   :  { %2732 = vmatprep.subr.bf16.mxu1 %v3046_v0 }
 0x306   :  { %2734 = vmatpush3.bf16.msra.mxu1 %v3188_v12 }
 0x307   :  { %2741 = vmatprep.subr.bf16.mxu1 %v3046_v0 }
 0x3d4   :  { %v414_v35 = vpop.f32.mrb[2].mxu1 }
 0x3d5   :  { %v415_v36 = vadd.f32 %v414_v35, %v195_v34  ;;  %v2499_v37 = vpop.f32.mrb[3].mxu1 }
 0x3d7   :  { %2851 = vtanh.f32 %v415_v36  ;;  %v2302_v39 = vmul.f32 -1.442695, %v415_v36 }
 0x3d9   :  { %2853 = vpow2.f32 %v2302_v39 }
 0x3e1   :  { %v2852_v38 = vpop.eup %2851 }
 0x3e2   :  { %427 = vrot.lane.b32.xlu0 %v2852_v38, %s3049_s8 }
 0x3e3   :  { %v2854_v40 = vpop.eup %2853 }
 0x3e4   :  { %v421_v41 = vadd.f32 1.0, %v2854_v40 }
 0x3e6   :  { %2855 = vrcp.f32 %v421_v41  ;;  %v210_v41 = vadd.f32 %v3209_v13, %v3257_v60  ;;  %v215_v60 = vadd.f32 %v3255_v59, %v3209_v13 }
 0x3f0   :  { %v2856_v42 = vpop.eup %2855 }
 0x3f1   :  { %v425_v45 = vmul.f32 %v2856_v42, %v332_v29 }
 0x454   :  { %v428_v43 = vpop.permute.xlu0 %427 }
 0x455   :  { %v430_v44 = vmul.f32 %v2856_v42, %v428_v43 }
 0x457   :  { %432 = vrot.lane.b32.xlu1 %v430_v44, %s3050_s3 }
 0x4c9   :  { %v433_v46 = vpop.permute.xlu1 %432 }
 0x4ca   :  { %v435_v47 = vadd.f32 %v433_v46, %v425_v45 }
 0x4cc   :  { %2857 = vtanh.f32 %v435_v47 }
 0x4d6   :  { %v2858_v54 = vpop.eup %2857 }
 0x4d7   :  { %438 = vrot.lane.b32.xlu0 %v2858_v54, %s3049_s8 }
 0x549   :  { %v439_v55 = vpop.permute.xlu0 %438 }
 0x54a   :  { %v441_v56 = vmul.f32 %v2856_v42, %v439_v55 }
 0x54c   :  { %443 = vrot.lane.b32.xlu1 %v441_v56, %s3050_s3 }
 0x5be   :  { %v444_v63 = vpop.permute.xlu1 %443 }
 0x5bf   :  { %447 = vst.msk [vmem:[#allocation2 + $0x8] sm:$0xff] %vm241_vm2, %v444_v63  ;;  %2509 = vmatmul.mubr.msk.f32.vlgmr.msra.gmra.mrb[8].mxu0 %vm241_vm2, %v444_v63 }
 0x5c0   :  { %2737 = vmatpush3.bf16.msra.mxu0 %v3175_v8  ;;  %2530 = vmatprep.mubr.msk.f32.mxu0 %vm3047_vm0, %v3048_v1 }
 0x5c1   :  { %2738 = vmatprep.subr.bf16.mxu0 %v3046_v0 }
 0x5c4   :  { %2740 = vmatpush3.bf16.msra.mxu0 %v3188_v12 }
 0x5c5   :  { %2747 = vmatprep.subr.bf16.mxu0 %v3046_v0 }
 0x692   :  { %v518_v3 = vpop.f32.mrb[8].mxu0 }
 0x693   :  { %v519_v4 = vadd.f32 %v518_v3, %v200_v2  ;;  %v2510_v5 = vpop.f32.mrb[9].mxu0 }
 0x695   :  { %2859 = vtanh.f32 %v519_v4  ;;  %v2304_v7 = vmul.f32 -1.442695, %v519_v4 }
 0x697   :  { %2861 = vpow2.f32 %v2304_v7 }
 0x69f   :  { %v2860_v6 = vpop.eup %2859 }
 0x6a0   :  { %531 = vrot.lane.b32.xlu0 %v2860_v6, %s3049_s8 }
 0x6a1   :  { %v2862_v9 = vpop.eup %2861 }
 0x6a2   :  { %v525_v10 = vadd.f32 1.0, %v2862_v9 }
 0x6a4   :  { %2863 = vrcp.f32 %v525_v10 }
 0x6ae   :  { %v2864_v11 = vpop.eup %2863 }
 0x6af   :  { %v529_v16 = vmul.f32 %v2864_v11, %v435_v47 }
 0x712   :  { %v532_v14 = vpop.permute.xlu0 %531 }
 0x713   :  { %v534_v15 = vmul.f32 %v2864_v11, %v532_v14  ;;  %v1080_v14 = vld [vmem:[%s3543_s4] sm:$0xff] }
 0x715   :  { %536 = vrot.lane.b32.xlu1 %v534_v15, %s3050_s3  ;;  %v1081_v15 = vld [vmem:[%s3543_s4 + $0x8] sm:$0xff] }
 0x787   :  { %v537_v17 = vpop.permute.xlu1 %536 }
 0x788   :  { %v539_v18 = vadd.f32 %v537_v17, %v529_v16  ;;  %v2759_v16 = vpack.c.bf16 %v1081_v15, %v1080_v14 }
 0x78a   :  { %2865 = vtanh.f32 %v539_v18 }
 0x794   :  { %v2866_v19 = vpop.eup %2865 }
 0x795   :  { %542 = vrot.lane.b32.xlu0 %v2866_v19, %s3049_s8 }
 0x807   :  { %v543_v20 = vpop.permute.xlu0 %542 }
 0x808   :  { %v545_v21 = vmul.f32 %v2864_v11, %v543_v20  ;;  %v1082_v20 = vld [vmem:[%s3543_s4 + $0x10] sm:$0xff] }
 0x80a   :  { %547 = vrot.lane.b32.xlu1 %v545_v21, %s3050_s3  ;;  %v1083_v21 = vld [vmem:[%s3543_s4 + $0x18] sm:$0xff] }
 0x87c   :  { %v548_v22 = vpop.permute.xlu1 %547 }
 0x87d   :  { %551 = vst.msk [vmem:[#allocation2 + $0x10] sm:$0xff] %vm241_vm2, %v548_v22  ;;  %2520 = vmatmul.mubr.msk.f32.vlgmr.msra.gmra.mrb[4].mxu1 %vm241_vm2, %v548_v22  ;;  %v2763_v22 = vpack.c.bf16 %v1083_v21, %v1082_v20 }
 0x87e   :  { %2743 = vmatpush3.bf16.msra.mxu1 %v3175_v8  ;;  %2541 = vmatprep.mubr.msk.f32.mxu1 %vm3047_vm0, %v3048_v1 }
 0x87f   :  { %2744 = vmatprep.subr.bf16.mxu1 %v3046_v0 }
 0x882   :  { %2746 = vmatpush3.bf16.msra.mxu1 %v3188_v12 }
 0x883   :  { %2753 = vmatprep.subr.bf16.mxu1 %v3046_v0 }
 0x950   :  { %v622_v24 = vpop.f32.mrb[4].mxu1 }
 0x951   :  { %v623_v25 = vadd.f32 %v622_v24, %v205_v23  ;;  %v2521_v26 = vpop.f32.mrb[5].mxu1  ;;  %v1072_v24 = vld [vmem:[#allocation2] sm:$0xff] }
 0x952   :  { %v1074_v26 = vld [vmem:[#allocation2 + $0x10] sm:$0xff] }
 0x953   :  { %2867 = vtanh.f32 %v623_v25  ;;  %v2306_v28 = vmul.f32 -1.442695, %v623_v25  ;;  %v1073_v25 = vld [vmem:[#allocation2 + $0x8] sm:$0xff] }
 0x955   :  { %2869 = vpow2.f32 %v2306_v28 }
 0x95d   :  { %v2868_v27 = vpop.eup %2867 }
 0x95e   :  { %635 = vrot.lane.b32.xlu0 %v2868_v27, %s3049_s8 }
 0x95f   :  { %v2870_v29 = vpop.eup %2869 }
 0x960   :  { %v629_v30 = vadd.f32 1.0, %v2870_v29 }
 0x962   :  { %2871 = vrcp.f32 %v629_v30  ;;  %v220_v30 = vadd.f32 %v3209_v13, %v3261_v62 }
 0x96c   :  { %v2872_v31 = vpop.eup %2871 }
 0x96d   :  { %v633_v34 = vmul.f32 %v2872_v31, %v539_v18 }
 0x9d0   :  { %v636_v32 = vpop.permute.xlu0 %635 }
 0x9d1   :  { %v638_v33 = vmul.f32 %v2872_v31, %v636_v32 }
 0x9d3   :  { %640 = vrot.lane.b32.xlu1 %v638_v33, %s3050_s3 }
 0xa45   :  { %v641_v35 = vpop.permute.xlu1 %640 }
 0xa46   :  { %v643_v36 = vadd.f32 %v641_v35, %v633_v34 }
 0xa48   :  { %2873 = vtanh.f32 %v643_v36 }
 0xa52   :  { %v2874_v37 = vpop.eup %2873 }
 0xa53   :  { %646 = vrot.lane.b32.xlu0 %v2874_v37, %s3049_s8 }
 0xac5   :  { %v647_v38 = vpop.permute.xlu0 %646 }
 0xac6   :  { %v649_v39 = vmul.f32 %v2872_v31, %v647_v38 }
 0xac8   :  { %651 = vrot.lane.b32.xlu1 %v649_v39, %s3050_s3 }
 0xb3a   :  { %v652_v40 = vpop.permute.xlu1 %651 }
 0xb3b   :  { %655 = vst.msk [vmem:[#allocation2 + $0x18] sm:$0xff] %vm241_vm2, %v652_v40  ;;  %2531 = vmatmul.mubr.msk.f32.vlgmr.msra.gmra.mrb[10].mxu0 %vm241_vm2, %v652_v40 }
 0xb3c   :  { %2749 = vmatpush3.bf16.msra.mxu0 %v3175_v8  ;;  %2552 = vmatprep.mubr.msk.f32.mxu0 %vm3047_vm0, %v3048_v1 }
 0xb3d   :  { %2750 = vmatprep.subr.bf16.mxu0 %v3046_v0 }
 0xb40   :  { %2752 = vmatpush3.bf16.msra.mxu0 %v3188_v12 }
 0xb41   :  { %2760 = vmatprep.subr.bf16.mxu0 %v2759_v16 }
 0xb42   :  { %v1075_v27 = vld [vmem:[#allocation2 + $0x18] sm:$0xff] }
 0xc0e   :  { %v726_v42 = vpop.f32.mrb[10].mxu0 }
 0xc0f   :  { %v727_v43 = vadd.f32 %v726_v42, %v210_v41  ;;  %v2532_v44 = vpop.f32.mrb[11].mxu0 }
 0xc11   :  { %2875 = vtanh.f32 %v727_v43  ;;  %v2308_v46 = vmul.f32 -1.442695, %v727_v43 }
 0xc13   :  { %2877 = vpow2.f32 %v2308_v46 }
 0xc1b   :  { %v2876_v45 = vpop.eup %2875 }
 0xc1c   :  { %739 = vrot.lane.b32.xlu0 %v2876_v45, %s3049_s8 }
 0xc1d   :  { %v2878_v47 = vpop.eup %2877 }
 0xc1e   :  { %v733_v48 = vadd.f32 1.0, %v2878_v47 }
 0xc20   :  { %2879 = vrcp.f32 %v733_v48 }
 0xc2a   :  { %v2880_v49 = vpop.eup %2879 }
 0xc2b   :  { %v737_v52 = vmul.f32 %v2880_v49, %v643_v36 }
 0xc8e   :  { %v740_v50 = vpop.permute.xlu0 %739 }
 0xc8f   :  { %v742_v51 = vmul.f32 %v2880_v49, %v740_v50  ;;  %v1228_v50 = vld [vmem:[%s3544_s5] sm:$0xff] }
 0xc91   :  { %744 = vrot.lane.b32.xlu1 %v742_v51, %s3050_s3  ;;  %v1229_v51 = vld [vmem:[%s3544_s5 + $0x8] sm:$0xff] }
 0xd03   :  { %v745_v53 = vpop.permute.xlu1 %744 }
 0xd04   :  { %v747_v54 = vadd.f32 %v745_v53, %v737_v52  ;;  %v3361_v52 = vpack.c.bf16 %v1229_v51, %v1228_v50  ;;  %v1230_v53 = vld [vmem:[%s3544_s5 + $0x10] sm:$0xff] }
 0xd06   :  { %2881 = vtanh.f32 %v747_v54 }
 0xd10   :  { %v2882_v55 = vpop.eup %2881 }
 0xd11   :  { %750 = vrot.lane.b32.xlu0 %v2882_v55, %s3049_s8 }
 0xd83   :  { %v751_v56 = vpop.permute.xlu0 %750 }
 0xd84   :  { %v753_v57 = vmul.f32 %v2880_v49, %v751_v56 }
 0xd86   :  { %755 = vrot.lane.b32.xlu1 %v753_v57, %s3050_s3 }
 0xdf8   :  { %v756_v58 = vpop.permute.xlu1 %755 }
 0xdf9   :  { %759 = vst.msk [vmem:[#allocation2 + $0x20] sm:$0xff] %vm241_vm2, %v756_v58  ;;  %2542 = vmatmul.mubr.msk.f32.vlgmr.msra.gmra.mrb[6].mxu1 %vm241_vm2, %v756_v58 }
 0xdfa   :  { %2755 = vmatpush3.bf16.msra.mxu1 %v3175_v8  ;;  %2563 = vmatprep.mubr.msk.f32.mxu1 %vm3047_vm0, %v3048_v1 }
 0xdfb   :  { %2756 = vmatprep.subr.bf16.mxu1 %v3046_v0 }
 0xdfe   :  { %2758 = vmatpush3.bf16.msra.mxu1 %v3188_v12 }
 0xdff   :  { %2767 = vmatprep.subr.bf16.mxu1 %v3046_v0 }
 0xe00   :  { %v1076_v28 = vld [vmem:[#allocation2 + $0x20] sm:$0xff] }
 0xecc   :  { %v830_v63 = vpop.f32.mrb[6].mxu1 }
 0xecd   :  { %v831_v2 = vadd.f32 %v830_v63, %v215_v60  ;;  %v2543_v3 = vpop.f32.mrb[7].mxu1  ;;  %v225_v63 = vadd.f32 %v3259_v61, %v3209_v13 }
 0xecf   :  { %2883 = vtanh.f32 %v831_v2  ;;  %v2310_v8 = vmul.f32 -1.442695, %v831_v2 }
 0xed1   :  { %2885 = vpow2.f32 %v2310_v8  ;;  %v3397_v8 = vld [vmem:[%s3545_s6] ss:$0 sm:$0xff] }
 0xed9   :  { %v2884_v4 = vpop.eup %2883 }
 0xeda   :  { %843 = vrot.lane.b32.xlu0 %v2884_v4, %s3049_s8 }
 0xedb   :  { %v2886_v5 = vpop.eup %2885 }
 0xedc   :  { %v837_v6 = vadd.f32 1.0, %v2886_v5 }
 0xede   :  { %2887 = vrcp.f32 %v837_v6 }
 0xee8   :  { %v2888_v7 = vpop.eup %2887 }
 0xee9   :  { %v841_v10 = vmul.f32 %v2888_v7, %v747_v54  ;;  %v1231_v54 = vld [vmem:[%s3544_s5 + $0x18] sm:$0xff] }
 0xeea   :  { %v3371_v55 = vpack.c.bf16 %v1231_v54, %v1230_v53 }
 0xf4c   :  { %v844_v9 = vpop.permute.xlu0 %843 }
 0xf4d   :  { %v846_v12 = vmul.f32 %v2888_v7, %v844_v9 }
 0xf4f   :  { %848 = vrot.lane.b32.xlu1 %v846_v12, %s3050_s3 }
 0xfc1   :  { %v849_v11 = vpop.permute.xlu1 %848 }
 0xfc2   :  { %v851_v59 = vadd.f32 %v849_v11, %v841_v10 }
 0xfc4   :  { %2889 = vtanh.f32 %v851_v59 }
 0xfce   :  { %v2890_v17 = vpop.eup %2889 }
 0xfcf   :  { %854 = vrot.lane.b32.xlu0 %v2890_v17, %s3049_s8 }
0x1041   :  { %v855_v18 = vpop.permute.xlu0 %854 }
0x1042   :  { %v857_v19 = vmul.f32 %v2888_v7, %v855_v18 }
0x1044   :  { %859 = vrot.lane.b32.xlu1 %v857_v19, %s3050_s3 }
0x10b6   :  { %v860_v23 = vpop.permute.xlu1 %859 }
0x10b7   :  { %863 = vst.msk [vmem:[#allocation2 + $0x28] sm:$0xff] %vm241_vm2, %v860_v23  ;;  %2553 = vmatmul.mubr.msk.f32.vlgmr.msra.gmra.mrb[12].mxu0 %vm241_vm2, %v860_v23 }
0x10b8   :  { %2762 = vmatpush3.bf16.msra.mxu0 %v2759_v16  ;;  %2574 = vmatprep.mubr.msk.f32.mxu0 %vm241_vm2, %v1072_v24 }
0x10b9   :  { %2764 = vmatprep.subr.bf16.mxu0 %v2763_v22 }
0x10bc   :  { %2766 = vmatpush3.bf16.msra.mxu0 %v2763_v22 }
0x10bd   :  { %2779 = vmatprep.subr.bf16.mxu0 %v3046_v0 }
0x10be   :  { %v1077_v29 = vld [vmem:[#allocation2 + $0x28] sm:$0xff] }
0x10bf   :  { %2575 = vmatmul.mubr.msk.f32.vlgmr.msra.gmra.mrb[14].mxu0 %vm241_vm2, %v1073_v25 }
0x10c0   :  { %2577 = vmatprep.mubr.msk.f32.mxu0 %vm241_vm2, %v1074_v26  ;;  %2781 = vmatpush3.bf16.msra.mxu0 %v3361_v52 }
0x10c1   :  { %2782 = vmatprep.subr.bf16.mxu0 %v3046_v0 }
0x10c3   :  { %2578 = vmatmul.mubr.msk.f32.gmra.mrb[16].mxu0 %vm241_vm2, %v1075_v27 }
0x10c4   :  { %2580 = vmatprep.mubr.msk.f32.mxu0 %vm241_vm2, %v1076_v28  ;;  %2784 = vmatpush3.bf16.msra.mxu0 %v3371_v55 }
0x10c5   :  { %2791 = vmatprep.subr.bf16.mxu0 %v3046_v0 }
0x10c7   :  { %2581 = vmatmul.mubr.msk.f32.gmra.mrb[18].mxu0 %vm241_vm2, %v1077_v29 }
0x118a   :  { %v934_v31 = vpop.f32.mrb[12].mxu0 }
0x118b   :  { %v935_v32 = vadd.f32 %v934_v31, %v220_v30  ;;  %v2554_v33 = vpop.f32.mrb[13].mxu0 }
0x118d   :  { %2891 = vtanh.f32 %v935_v32  ;;  %v2312_v41 = vmul.f32 -1.442695, %v935_v32 }
0x118f   :  { %2893 = vpow2.f32 %v2312_v41 }
0x1192   :  { %v3339_v34 = vpop.f32.mrb[14].mxu0 }
0x1193   :  { %v1181_v35 = vpop.f32.mrb[15].mxu0 }
0x1194   :  { %v1182_v5 = vadd.f32 %v3397_v8, %v1181_v35 }
0x1196   :  { %v3341_v36 = vpop.f32.mrb[16].mxu0 }
0x1197   :  { %v2892_v37 = vpop.eup %2891  ;;  %v3343_v38 = vpop.f32.mrb[17].mxu0 }
0x1198   :  { %947 = vrot.lane.b32.xlu0 %v2892_v37, %s3049_s8  ;;  %v1187_v37 = vadd.f32 %v3339_v34, %v3397_v8 }
0x1199   :  { %v2894_v62 = vpop.eup %2893 }
0x119a   :  { %v3346_v39 = vpop.f32.mrb[18].mxu0  ;;  %v941_v42 = vadd.f32 1.0, %v2894_v62 }
0x119b   :  { %v3348_v40 = vpop.f32.mrb[19].mxu0 }
0x119c   :  { %2895 = vrcp.f32 %v941_v42 }
0x11a6   :  { %v2896_v43 = vpop.eup %2895 }
0x11a7   :  { %v945_v46 = vmul.f32 %v2896_v43, %v851_v59 }
0x120a   :  { %v948_v44 = vpop.permute.xlu0 %947 }
0x120b   :  { %v950_v45 = vmul.f32 %v2896_v43, %v948_v44 }
0x120d   :  { %952 = vrot.lane.b32.xlu1 %v950_v45, %s3050_s3 }
0x127f   :  { %v953_v47 = vpop.permute.xlu1 %952 }
0x1280   :  { %v3351_v48 = vadd.f32 %v953_v47, %v945_v46 }
0x1282   :  { %2897 = vtanh.f32 %v3351_v48 }
0x128c   :  { %v2898_v49 = vpop.eup %2897 }
0x128d   :  { %958 = vrot.lane.b32.xlu0 %v2898_v49, %s3049_s8 }
0x12ff   :  { %v959_v56 = vpop.permute.xlu0 %958 }
0x1300   :  { %v961_v57 = vmul.f32 %v2896_v43, %v959_v56 }
0x1302   :  { %963 = vrot.lane.b32.xlu1 %v961_v57, %s3050_s3 }
0x1374   :  { %v964_v58 = vpop.permute.xlu1 %963 }
0x1375   :  { %967 = vst.msk [vmem:[#allocation2 + $0x30] sm:$0xff] %vm241_vm2, %v964_v58  ;;  %2564 = vmatmul.mubr.msk.f32.vlgmr.msra.gmra.mrb[8].mxu1 %vm241_vm2, %v964_v58 }
0x1376   :  { %2769 = vmatpush3.bf16.msra.mxu1 %v3361_v52  ;;  %2594 = vmatprep.mubr.msk.f32.mxu1 %vm3047_vm0, %v3048_v1 }
0x1377   :  { %2770 = vmatprep.subr.bf16.mxu1 %v3046_v0 }
0x137a   :  { %2772 = vmatpush3.bf16.msra.mxu1 %v3371_v55 }
0x137b   :  { %2773 = vmatprep.subr.bf16.mxu1 %v3046_v0 }
0x137c   :  { %v1078_v60 = vld [vmem:[#allocation2 + $0x30] sm:$0xff] }
0x137d   :  { %2595 = vmatmul.mubr.f32.vlgmr.msra.gmra.mrb[10].mxu1 %v3048_v1  ;;  %2583 = vmatprep.mubr.msk.f32.mxu0 %vm241_vm2, %v1078_v60 }
0x137e   :  { %2775 = vmatpush3.bf16.msra.mxu1 %v3361_v52  ;;  %2605 = vmatprep.mubr.msk.f32.mxu1 %vm3047_vm0, %v3048_v1 }
0x137f   :  { %2776 = vmatprep.subr.bf16.mxu1 %v3046_v0 }
0x1382   :  { %2778 = vmatpush3.bf16.msra.mxu1 %v3371_v55 }
0x1383   :  { %2785 = vmatprep.subr.bf16.mxu1 %v3046_v0 }
0x1448   :  { %v1038_v2 = vpop.f32.mrb[8].mxu1 }
0x1449   :  { %v1039_v3 = vadd.f32 %v1038_v2, %v225_v63  ;;  %v2565_v4 = vpop.f32.mrb[9].mxu1 }
0x144b   :  { %v2314_v20 = vmul.f32 -1.442695, %v1039_v3 }
0x1450   :  { %v1299_v6 = vpop.f32.mrb[10].mxu1 }
0x1451   :  { %v1300_v7 = vadd.f32 %v1299_v6, %v1182_v5  ;;  %v2596_v9 = vpop.f32.mrb[11].mxu1 }
0x1453   :  { %2899 = vtanh.f32 %v1300_v7  ;;  %v2324_v10 = vmul.f32 -1.442695, %v1300_v7 }
0x1455   :  { %2901 = vpow2.f32 %v2324_v10 }
0x145d   :  { %v2900_v12 = vpop.eup %2899 }
0x145e   :  { %1312 = vrot.lane.b32.xlu0 %v2900_v12, %s3049_s8 }
0x145f   :  { %v2902_v13 = vpop.eup %2901 }
0x1460   :  { %v1306_v61 = vadd.f32 1.0, %v2902_v13 }
0x1462   :  { %2903 = vrcp.f32 %v1306_v61 }
0x146c   :  { %v2904_v11 = vpop.eup %2903 }
0x146d   :  { %v1310_v15 = vmul.f32 0.0, %v2904_v11 }
0x14d0   :  { %v1313_v59 = vpop.permute.xlu0 %1312 }
0x14d1   :  { %v1315_v14 = vmul.f32 %v2904_v11, %v1313_v59 }
0x14d3   :  { %1317 = vrot.lane.b32.xlu1 %v1315_v14, %s3050_s3 }
0x1545   :  { %v1318_v16 = vpop.permute.xlu1 %1317 }
0x1546   :  { %v1320_v17 = vadd.f32 %v1318_v16, %v1310_v15 }
0x1548   :  { %2905 = vtanh.f32 %v1320_v17 }
0x1549   :  { %2907 = vtanh.f32 %v1039_v3  ;;  %v1192_v3 = vadd.f32 %v3397_v8, %v3343_v38 }
0x154a   :  { %2909 = vpow2.f32 %v2314_v20 }
0x1552   :  { %v2906_v18 = vpop.eup %2905 }
0x1553   :  { %1323 = vrot.lane.b32.xlu0 %v2906_v18, %s3049_s8  ;;  %v2908_v19 = vpop.eup %2907 }
0x1554   :  { %v2910_v21 = vpop.eup %2909 }
0x1555   :  { %v1045_v22 = vadd.f32 1.0, %v2910_v21 }
0x1557   :  { %1051 = vrot.lane.b32.xlu0 %v2908_v19, %s3049_s8  ;;  %2911 = vrcp.f32 %v1045_v22  ;;  %v1197_v19 = vadd.f32 %v3341_v36, %v3397_v8 }
0x1561   :  { %v2912_v25 = vpop.eup %2911 }
0x1562   :  { %v1049_v29 = vmul.f32 %v2912_v25, %v3351_v48 }
0x15c5   :  { %v1324_v23 = vpop.permute.xlu0 %1323 }
0x15c6   :  { %v1326_v24 = vmul.f32 %v2904_v11, %v1324_v23 }
0x15c8   :  { %1329 = vrot.lane.b32.xlu1 %v1326_v24, %s3050_s3 }
0x15c9   :  { %v1052_v26 = vpop.permute.xlu0 %1051 }
0x15ca   :  { %v1054_v27 = vmul.f32 %v2912_v25, %v1052_v26 }
0x15cc   :  { %1056 = vrot.lane.b32.xlu0 %v1054_v27, %s3050_s3 }
0x163a   :  { %v1330_v28 = vpop.permute.xlu1 %1329 }
0x163b   :  { %2606 = vmatmul.mubr.msk.f32.vlgmr.msra.gmra.mrb[12].mxu1 %vm241_vm2, %v1330_v28 }
0x163c   :  { %2787 = vmatpush3.bf16.msra.mxu1 %v3361_v52  ;;  %2627 = vmatprep.mubr.msk.f32.mxu1 %vm3047_vm0, %v3048_v1 }
0x163d   :  { %2788 = vmatprep.subr.bf16.mxu1 %v3046_v0 }
0x163e   :  { %v1057_v30 = vpop.permute.xlu0 %1056 }
0x163f   :  { %v1059_v31 = vadd.f32 %v1057_v30, %v1049_v29 }
0x1640   :  { %2790 = vmatpush3.bf16.msra.mxu1 %v3371_v55 }
0x1641   :  { %2913 = vtanh.f32 %v1059_v31  ;;  %2797 = vmatprep.subr.bf16.mxu1 %v3046_v0 }
0x164b   :  { %v2914_v32 = vpop.eup %2913 }
0x164c   :  { %1062 = vrot.lane.b32.xlu0 %v2914_v32, %s3049_s8 }
0x16be   :  { %v1063_v33 = vpop.permute.xlu0 %1062 }
0x16bf   :  { %v1065_v35 = vmul.f32 %v2912_v25, %v1063_v33 }
0x16c1   :  { %1067 = vrot.lane.b32.xlu0 %v1065_v35, %s3050_s3 }
0x170e   :  { %v1399_v41 = vpop.f32.mrb[12].mxu1 }
0x170f   :  { %v1400_v62 = vadd.f32 %v1399_v41, %v1187_v37  ;;  %v2607_v42 = vpop.f32.mrb[13].mxu1  ;;  %v1202_v41 = vadd.f32 %v3397_v8, %v3348_v40 }
0x1711   :  { %2915 = vtanh.f32 %v1400_v62  ;;  %v2326_v46 = vmul.f32 -1.442695, %v1400_v62 }
0x1713   :  { %2917 = vpow2.f32 %v2326_v46 }
0x171b   :  { %v2916_v43 = vpop.eup %2915 }
0x171c   :  { %1412 = vrot.lane.b32.xlu1 %v2916_v43, %s3049_s8 }
0x171d   :  { %v2918_v47 = vpop.eup %2917 }
0x171e   :  { %v1406_v34 = vadd.f32 1.0, %v2918_v47 }
0x1720   :  { %2919 = vrcp.f32 %v1406_v34 }
0x172a   :  { %v2920_v48 = vpop.eup %2919 }
0x172b   :  { %v1410_v51 = vmul.f32 %v2920_v48, %v1320_v17 }
0x1733   :  { %v1068_v44 = vpop.permute.xlu0 %1067 }
0x1734   :  { %1071 = vst.msk [vmem:[#allocation2 + $0x38] sm:$0xff] %vm241_vm2, %v1068_v44 }
0x173b   :  { %v1079_v45 = vld [vmem:[#allocation2 + $0x38] sm:$0xff] }
0x173c   :  { %2584 = vmatmul.mubr.msk.f32.gmra.mrb[20].mxu0 %vm241_vm2, %v1079_v45 }
0x173d   :  { %2616 = vmatprep.mubr.msk.f32.mxu0 %vm3047_vm0, %v3048_v1 }
0x178e   :  { %v1413_v49 = vpop.permute.xlu1 %1412 }
0x178f   :  { %v1415_v50 = vmul.f32 %v2920_v48, %v1413_v49 }
0x1791   :  { %1417 = vrot.lane.b32.xlu1 %v1415_v50, %s3050_s3 }
0x1803   :  { %v1418_v53 = vpop.permute.xlu1 %1417 }
0x1804   :  { %v1420_v54 = vadd.f32 %v1418_v53, %v1410_v51 }
0x1806   :  { %2921 = vtanh.f32 %v1420_v54 }
0x180f   :  { %v3424_v56 = vpop.f32.mrb[20].mxu0 }
0x1810   :  { %v2922_v57 = vpop.eup %2921  ;;  %v3426_v58 = vpop.f32.mrb[21].mxu0 }
0x1811   :  { %1423 = vrot.lane.b32.xlu1 %v2922_v57, %s3049_s8 }
0x1883   :  { %v1424_v60 = vpop.permute.xlu1 %1423 }
0x1884   :  { %v1426_v63 = vmul.f32 %v2920_v48, %v1424_v60 }
0x1886   :  { %1429 = vrot.lane.b32.xlu1 %v1426_v63, %s3050_s3  ;;  %v1207_v63 = vadd.f32 %v3346_v39, %v3397_v8 }
0x18f8   :  { %v1430_v2 = vpop.permute.xlu1 %1429 }
0x18f9   :  { %2617 = vmatmul.mubr.msk.f32.vlgmr.msra.gmra.mrb[22].mxu0 %vm241_vm2, %v1430_v2 }
0x18fa   :  { %2793 = vmatpush3.bf16.msra.mxu0 %v3361_v52  ;;  %2638 = vmatprep.mubr.msk.f32.mxu0 %vm3047_vm0, %v3048_v1 }
0x18fb   :  { %2794 = vmatprep.subr.bf16.mxu0 %v3046_v0 }
0x18fe   :  { %2796 = vmatpush3.bf16.msra.mxu0 %v3371_v55 }
0x18ff   :  { %2803 = vmatprep.subr.bf16.mxu0 %v3046_v0 }
0x19cc   :  { %v1499_v4 = vpop.f32.mrb[22].mxu0 }
0x19cd   :  { %v1500_v5 = vadd.f32 %v1499_v4, %v1192_v3  ;;  %v2618_v6 = vpop.f32.mrb[23].mxu0 }
0x19cf   :  { %2923 = vtanh.f32 %v1500_v5  ;;  %v2328_v9 = vmul.f32 -1.442695, %v1500_v5 }
0x19d1   :  { %2925 = vpow2.f32 %v2328_v9 }
0x19d9   :  { %v2924_v7 = vpop.eup %2923 }
0x19da   :  { %1512 = vrot.lane.b32.xlu0 %v2924_v7, %s3049_s8 }
0x19db   :  { %v2926_v12 = vpop.eup %2925 }
0x19dc   :  { %v1506_v10 = vadd.f32 1.0, %v2926_v12 }
0x19de   :  { %2927 = vrcp.f32 %v1506_v10 }
0x19e8   :  { %v2928_v13 = vpop.eup %2927 }
0x19e9   :  { %v1510_v59 = vmul.f32 %v2928_v13, %v1420_v54 }
0x1a4c   :  { %v1513_v61 = vpop.permute.xlu0 %1512 }
0x1a4d   :  { %v1515_v11 = vmul.f32 %v2928_v13, %v1513_v61 }
0x1a4f   :  { %1517 = vrot.lane.b32.xlu1 %v1515_v11, %s3050_s3 }
0x1ac1   :  { %v1518_v14 = vpop.permute.xlu1 %1517 }
0x1ac2   :  { %v1520_v38 = vadd.f32 %v1518_v14, %v1510_v59 }
0x1ac4   :  { %2929 = vtanh.f32 %v1520_v38 }
0x1ace   :  { %v2930_v15 = vpop.eup %2929 }
0x1acf   :  { %1523 = vrot.lane.b32.xlu0 %v2930_v15, %s3049_s8 }
0x1b41   :  { %v1524_v16 = vpop.permute.xlu0 %1523 }
0x1b42   :  { %v1526_v17 = vmul.f32 %v2928_v13, %v1524_v16 }
0x1b44   :  { %1529 = vrot.lane.b32.xlu1 %v1526_v17, %s3050_s3 }
0x1bb6   :  { %v1530_v18 = vpop.permute.xlu1 %1529 }
0x1bb7   :  { %2628 = vmatmul.mubr.msk.f32.vlgmr.msra.gmra.mrb[14].mxu1 %vm241_vm2, %v1530_v18 }
0x1bb8   :  { %2799 = vmatpush3.bf16.msra.mxu1 %v3361_v52  ;;  %2649 = vmatprep.mubr.msk.f32.mxu1 %vm3047_vm0, %v3048_v1 }
0x1bb9   :  { %2800 = vmatprep.subr.bf16.mxu1 %v3046_v0 }
0x1bbc   :  { %2802 = vmatpush3.bf16.msra.mxu1 %v3371_v55 }
0x1bbd   :  { %2809 = vmatprep.subr.bf16.mxu1 %v3046_v0 }
0x1c8a   :  { %v1599_v20 = vpop.f32.mrb[14].mxu1 }
0x1c8b   :  { %v1600_v21 = vadd.f32 %v1599_v20, %v1197_v19  ;;  %v2629_v22 = vpop.f32.mrb[15].mxu1 }
0x1c8d   :  { %2931 = vtanh.f32 %v1600_v21  ;;  %v2330_v24 = vmul.f32 -1.442695, %v1600_v21 }
0x1c8f   :  { %2933 = vpow2.f32 %v2330_v24 }
0x1c97   :  { %v2932_v23 = vpop.eup %2931 }
0x1c98   :  { %1612 = vrot.lane.b32.xlu0 %v2932_v23, %s3049_s8 }
0x1c99   :  { %v2934_v25 = vpop.eup %2933 }
0x1c9a   :  { %v1606_v26 = vadd.f32 1.0, %v2934_v25 }
0x1c9c   :  { %2935 = vrcp.f32 %v1606_v26 }
0x1ca6   :  { %v2936_v27 = vpop.eup %2935 }
0x1ca7   :  { %v1610_v30 = vmul.f32 %v2936_v27, %v1520_v38  ;;  %v1212_v38 = vadd.f32 %v3397_v8, %v3426_v58 }
0x1d0a   :  { %v1613_v28 = vpop.permute.xlu0 %1612 }
0x1d0b   :  { %v1615_v29 = vmul.f32 %v2936_v27, %v1613_v28 }
0x1d0d   :  { %1617 = vrot.lane.b32.xlu1 %v1615_v29, %s3050_s3 }
0x1d7f   :  { %v1618_v31 = vpop.permute.xlu1 %1617 }
0x1d80   :  { %v1620_v36 = vadd.f32 %v1618_v31, %v1610_v30  ;;  %v1217_v31 = vadd.f32 %v3424_v56, %v3397_v8  ;;  %v2027_v56 = vld [vmem:[%s3546_s7] sm:$0xff] }
0x1d82   :  { %2937 = vtanh.f32 %v1620_v36 }
0x1d8c   :  { %v2938_v32 = vpop.eup %2937 }
0x1d8d   :  { %1623 = vrot.lane.b32.xlu0 %v2938_v32, %s3049_s8 }
0x1dff   :  { %v1624_v33 = vpop.permute.xlu0 %1623 }
0x1e00   :  { %v1626_v35 = vmul.f32 %v2936_v27, %v1624_v33 }
0x1e02   :  { %1629 = vrot.lane.b32.xlu1 %v1626_v35, %s3050_s3 }
0x1e74   :  { %v1630_v37 = vpop.permute.xlu1 %1629 }
0x1e75   :  { %2639 = vmatmul.mubr.msk.f32.vlgmr.msra.gmra.mrb[24].mxu0 %vm241_vm2, %v1630_v37 }
0x1e76   :  { %2805 = vmatpush3.bf16.msra.mxu0 %v3361_v52  ;;  %2660 = vmatprep.mubr.msk.f32.mxu0 %vm3047_vm0, %v3048_v1 }
0x1e77   :  { %2806 = vmatprep.subr.bf16.mxu0 %v3046_v0 }
0x1e7a   :  { %2808 = vmatpush3.bf16.msra.mxu0 %v3371_v55 }
0x1e7b   :  { %2815 = vmatprep.subr.bf16.mxu0 %v3046_v0 }
0x1f48   :  { %v1699_v62 = vpop.f32.mrb[24].mxu0 }
0x1f49   :  { %v1700_v42 = vadd.f32 %v1699_v62, %v1202_v41  ;;  %v2640_v43 = vpop.f32.mrb[25].mxu0 }
0x1f4b   :  { %2939 = vtanh.f32 %v1700_v42  ;;  %v2332_v45 = vmul.f32 -1.442695, %v1700_v42 }
0x1f4d   :  { %2941 = vpow2.f32 %v2332_v45 }
0x1f55   :  { %v2940_v44 = vpop.eup %2939 }
0x1f56   :  { %1712 = vrot.lane.b32.xlu0 %v2940_v44, %s3049_s8 }
0x1f57   :  { %v2942_v46 = vpop.eup %2941 }
0x1f58   :  { %v1706_v47 = vadd.f32 1.0, %v2942_v46 }
0x1f5a   :  { %2943 = vrcp.f32 %v1706_v47  ;;  %v2028_v47 = vld [vmem:[%s3546_s7 + $0x8] sm:$0xff] }
0x1f64   :  { %v2944_v34 = vpop.eup %2943 }
0x1f65   :  { %v1710_v50 = vmul.f32 %v2944_v34, %v1620_v36 }
0x1fc8   :  { %v1713_v48 = vpop.permute.xlu0 %1712 }
0x1fc9   :  { %v1715_v49 = vmul.f32 %v2944_v34, %v1713_v48  ;;  %v2816_v48 = vpack.c.bf16 %v2028_v47, %v2027_v56 }
0x1fcb   :  { %1717 = vrot.lane.b32.xlu1 %v1715_v49, %s3050_s3  ;;  %v2030_v49 = vld [vmem:[%s3546_s7 + $0x18] sm:$0xff] }
0x203d   :  { %v1718_v51 = vpop.permute.xlu1 %1717 }
0x203e   :  { %v1720_v40 = vadd.f32 %v1718_v51, %v1710_v50 }
0x2040   :  { %2945 = vtanh.f32 %v1720_v40 }
0x204a   :  { %v2946_v53 = vpop.eup %2945 }
0x204b   :  { %1723 = vrot.lane.b32.xlu0 %v2946_v53, %s3049_s8  ;;  %v2115_v53 = vld [vmem:[%s3548_s9 + $0x8] sm:$0xff] }
0x20bd   :  { %v1724_v54 = vpop.permute.xlu0 %1723 }
0x20be   :  { %v1726_v57 = vmul.f32 %v2944_v34, %v1724_v54  ;;  %v2029_v34 = vld [vmem:[%s3546_s7 + $0x10] sm:$0xff] }
0x20bf   :  { %v2819_v50 = vpack.c.bf16 %v2030_v49, %v2029_v34 }
0x20c0   :  { %1729 = vrot.lane.b32.xlu1 %v1726_v57, %s3050_s3 }
0x2132   :  { %v1730_v60 = vpop.permute.xlu1 %1729 }
0x2133   :  { %2650 = vmatmul.mubr.msk.f32.vlgmr.msra.gmra.mrb[16].mxu1 %vm241_vm2, %v1730_v60 }
0x2134   :  { %2811 = vmatpush3.bf16.msra.mxu1 %v3361_v52  ;;  %2671 = vmatprep.mubr.msk.f32.mxu1 %vm3047_vm0, %v3048_v1 }
0x2135   :  { %2812 = vmatprep.subr.bf16.mxu1 %v3046_v0 }
0x2138   :  { %2814 = vmatpush3.bf16.msra.mxu1 %v3371_v55 }
0x2139   :  { %2821 = vmatprep.subr.bf16.mxu1 %v3046_v0 }
0x2206   :  { %v1799_v2 = vpop.f32.mrb[16].mxu1 }
0x2207   :  { %v1800_v3 = vadd.f32 %v1799_v2, %v1207_v63  ;;  %v2651_v4 = vpop.f32.mrb[17].mxu1  ;;  %v2116_v2 = vld [vmem:[%s3548_s9 + $0x10] sm:$0xff] }
0x2209   :  { %2947 = vtanh.f32 %v1800_v3  ;;  %v2334_v52 = vmul.f32 -1.442695, %v1800_v3  ;;  %v2117_v3 = vld [vmem:[%s3548_s9 + $0x18] sm:$0xff] }
0x220a   :  { %v2825_v4 = vpack.c.bf16 %v2117_v3, %v2116_v2 }
0x220b   :  { %2949 = vpow2.f32 %v2334_v52  ;;  %v2200_v52 = vld [vmem:[#allocation8 + $0x8] sm:$0xff] }
0x2213   :  { %v2948_v5 = vpop.eup %2947 }
0x2214   :  { %1812 = vrot.lane.b32.xlu0 %v2948_v5, %s3049_s8  ;;  %v2199_v5 = vld [vmem:[#allocation8] sm:$0xff] }
0x2215   :  { %v2950_v6 = vpop.eup %2949 }
0x2216   :  { %v1806_v7 = vadd.f32 1.0, %v2950_v6  ;;  %v2828_v6 = vpack.c.bf16 %v2200_v52, %v2199_v5 }
0x2218   :  { %2951 = vrcp.f32 %v1806_v7  ;;  %v2339_v7 = vld [vmem:[#allocation4] ss:$0 sm:$0xff] }
0x2222   :  { %v2952_v9 = vpop.eup %2951 }
0x2223   :  { %v1810_v10 = vmul.f32 %v2952_v9, %v1720_v40  ;;  %v2114_v40 = vld [vmem:[%s3548_s9] sm:$0xff] }
0x2224   :  { %v2822_v54 = vpack.c.bf16 %v2115_v53, %v2114_v40 }
0x2286   :  { %v1813_v12 = vpop.permute.xlu0 %1812 }
0x2287   :  { %v1815_v55 = vmul.f32 %v2952_v9, %v1813_v12 }
0x2289   :  { %1817 = vrot.lane.b32.xlu1 %v1815_v55, %s3050_s3 }
0x22fb   :  { %v1818_v13 = vpop.permute.xlu1 %1817 }
0x22fc   :  { %v1820_v39 = vadd.f32 %v1818_v13, %v1810_v10  ;;  %v2201_v10 = vld [vmem:[#allocation8 + $0x10] sm:$0xff]  ;;  %v2202_v13 = vld [vmem:[#allocation8 + $0x18] sm:$0xff] }
0x22fe   :  { %2953 = vtanh.f32 %v1820_v39 }
0x2308   :  { %v2954_v61 = vpop.eup %2953 }
0x2309   :  { %1823 = vrot.lane.b32.xlu0 %v2954_v61, %s3049_s8  ;;  %v2341_v61 = vld [vmem:[#allocation6] ss:$0 sm:$0xff] }
0x237b   :  { %v1824_v11 = vpop.permute.xlu0 %1823 }
0x237c   :  { %v1826_v59 = vmul.f32 %v2952_v9, %v1824_v11 }
0x237e   :  { %1829 = vrot.lane.b32.xlu1 %v1826_v59, %s3050_s3 }
0x23f0   :  { %v1830_v14 = vpop.permute.xlu1 %1829 }
0x23f1   :  { %2661 = vmatmul.mubr.msk.f32.vlgmr.msra.gmra.mrb[26].mxu0 %vm241_vm2, %v1830_v14 }
0x23f2   :  { %2682 = vmatprep.mubr.msk.f32.mxu0 %vm3047_vm0, %v3048_v1  ;;  %2817 = vmatpush3.bf16.msra.mxu0 %v2816_v48 }
0x23f3   :  { %2818 = vmatprep.subr.bf16.mxu0 %v3046_v0 }
0x23f6   :  { %2820 = vmatpush3.bf16.msra.mxu0 %v2819_v50 }
0x23f7   :  { %2827 = vmatprep.subr.bf16.mxu0 %v3046_v0 }
0x24c4   :  { %v1899_v15 = vpop.f32.mrb[26].mxu0 }
0x24c5   :  { %v1900_v16 = vadd.f32 %v1899_v15, %v1212_v38  ;;  %v2662_v17 = vpop.f32.mrb[27].mxu0 }
0x24c7   :  { %2955 = vtanh.f32 %v1900_v16  ;;  %v2336_v19 = vmul.f32 -1.442695, %v1900_v16 }
0x24c9   :  { %2957 = vpow2.f32 %v2336_v19 }
0x24d1   :  { %v2956_v18 = vpop.eup %2955 }
0x24d2   :  { %1912 = vrot.lane.b32.xlu0 %v2956_v18, %s3049_s8 }
0x24d3   :  { %v2958_v20 = vpop.eup %2957 }
0x24d4   :  { %v1906_v21 = vadd.f32 1.0, %v2958_v20 }
0x24d6   :  { %2959 = vrcp.f32 %v1906_v21 }
0x24e0   :  { %v2960_v22 = vpop.eup %2959 }
0x24e1   :  { %v1910_v25 = vmul.f32 %v2960_v22, %v1820_v39  ;;  %v2831_v39 = vpack.c.bf16 %v2202_v13, %v2201_v10 }
0x2544   :  { %v1913_v23 = vpop.permute.xlu0 %1912 }
0x2545   :  { %v1915_v24 = vmul.f32 %v2960_v22, %v1913_v23 }
0x2547   :  { %1917 = vrot.lane.b32.xlu1 %v1915_v24, %s3050_s3 }
0x25b9   :  { %v1918_v26 = vpop.permute.xlu1 %1917 }
0x25ba   :  { %v1920_v58 = vadd.f32 %v1918_v26, %v1910_v25 }
0x25bc   :  { %2961 = vtanh.f32 %v1920_v58 }
0x25c6   :  { %v2962_v27 = vpop.eup %2961 }
0x25c7   :  { %1923 = vrot.lane.b32.xlu0 %v2962_v27, %s3049_s8 }
0x2639   :  { %v1924_v28 = vpop.permute.xlu0 %1923 }
0x263a   :  { %v1926_v29 = vmul.f32 %v2960_v22, %v1924_v28 }
0x263c   :  { %1929 = vrot.lane.b32.xlu1 %v1926_v29, %s3050_s3 }
0x26ae   :  { %v1930_v30 = vpop.permute.xlu1 %1929 }
0x26af   :  { %2672 = vmatmul.mubr.msk.f32.vlgmr.msra.gmra.mrb[18].mxu1 %vm241_vm2, %v1930_v30 }
0x26b0   :  { %2693 = vmatprep.mubr.msk.f32.mxu1 %vm3047_vm0, %v3048_v1  ;;  %2823 = vmatpush3.bf16.msra.mxu1 %v2822_v54 }
0x26b1   :  { %2824 = vmatprep.subr.bf16.mxu1 %v3046_v0 }
0x26b4   :  { %2826 = vmatpush3.bf16.msra.mxu1 %v2825_v4 }
0x2782   :  { %v1999_v36 = vpop.f32.mrb[18].mxu1 }
0x2783   :  { %v2000_v32 = vadd.f32 %v1999_v36, %v1217_v31  ;;  %v2673_v33 = vpop.f32.mrb[19].mxu1 }
0x2785   :  { %2963 = vtanh.f32 %v2000_v32  ;;  %v2338_v37 = vmul.f32 -1.442695, %v2000_v32 }
0x2787   :  { %2965 = vpow2.f32 %v2338_v37 }
0x278f   :  { %v2964_v35 = vpop.eup %2963 }
0x2790   :  { %2012 = vrot.lane.b32.xlu0 %v2964_v35, %s3049_s8 }
0x2791   :  { %v2966_v41 = vpop.eup %2965 }
0x2792   :  { %v2006_v62 = vadd.f32 1.0, %v2966_v41 }
0x2794   :  { %2967 = vrcp.f32 %v2006_v62 }
0x279e   :  { %v2968_v42 = vpop.eup %2967 }
0x279f   :  { %v2010_v45 = vmul.f32 %v2968_v42, %v1920_v58 }
0x2802   :  { %v2013_v43 = vpop.permute.xlu0 %2012 }
0x2803   :  { %v2015_v44 = vmul.f32 %v2968_v42, %v2013_v43 }
0x2805   :  { %2017 = vrot.lane.b32.xlu1 %v2015_v44, %s3050_s3 }
0x2877   :  { %v2018_v46 = vpop.permute.xlu1 %2017 }
0x2878   :  { %v2020_v8 = vadd.f32 %v2018_v46, %v2010_v45 }
0x287a   :  { %2969 = vtanh.f32 %v2020_v8 }
0x2884   :  { %v2970_v51 = vpop.eup %2969 }
0x2885   :  { %2023 = vrot.lane.b32.xlu0 %v2970_v51, %s3049_s8 }
0x28f7   :  { %v2024_v57 = vpop.permute.xlu0 %2023 }
0x28f8   :  { %v2026_v60 = vmul.f32 %v2968_v42, %v2024_v57 }
0x28fa   :  { %2039 = vrot.lane.b32.xlu1 %v2026_v60, %s3050_s3 }
0x296c   :  { %v2040_v63 = vpop.permute.xlu1 %2039 }
0x296d   :  { %2683 = vmatmul.mubr.msk.f32.vlgmr.msra.gmra.mrb[28].mxu0 %vm241_vm2, %v2040_v63 }
0x296e   :  { %2704 = vmatprep.mubr.msk.f32.mxu0 %vm3047_vm0, %v3048_v1  ;;  %2829 = vmatpush3.bf16.msra.mxu0 %v2828_v6 }
0x296f   :  { %2830 = vmatprep.subr.bf16.mxu0 %v3046_v0  ;;  %v2343_v0 = vld [vmem:[%s3551_s12] ss:$0 sm:$0xff] }
0x2972   :  { %2832 = vmatpush3.bf16.msra.mxu0 %v2831_v39 }
0x2a40   :  { %v2109_v9 = vpop.f32.mrb[28].mxu0 }
0x2a41   :  { %v2110_v12 = vadd.f32 %v2339_v7, %v2109_v9  ;;  %v2684_v1 = vpop.f32.mrb[29].mxu0 }
0x2a43   :  { %v2113_v55 = vmax.f32 %v2110_v12, 0.0 }
0x2a45   :  { %2694 = vmatmul.mubr.msk.f32.vlgmr.msra.gmra.mrb[20].mxu1 %vm241_vm2, %v2113_v55 }
0x2b18   :  { %v2194_v11 = vpop.f32.mrb[20].mxu1 }
0x2b19   :  { %v2195_v59 = vadd.f32 %v2341_v61, %v2194_v11  ;;  %v2695_v14 = vpop.f32.mrb[21].mxu1 }
0x2b1b   :  { %v2198_v38 = vmax.f32 %v2195_v59, 0.0 }
0x2b1d   :  { %2705 = vmatmul.mubr.msk.f32.vlgmr.msra.gmra.mrb[30].mxu0 %vm241_vm2, %v2198_v38 }
0x2bf0   :  { %v2279_v15 = vpop.f32.mrb[30].mxu0 }
0x2bf1   :  { %v2280_v16 = vadd.f32 %v2343_v0, %v2279_v15  ;;  %v2706_v17 = vpop.f32.mrb[31].mxu0 }
0x2bf3   :  { %2284 = vst.msk [vmem:[%s3552_s13] sm:$0xff] %vm2283_vm3, %v2280_v16 }
0x2bf4   :  { %2289 = vsyncpa [#allocation5], 1 }
0x2bf5   :  { %2290 = vsyncpa [#allocation7], 1 }

</bundles_post_ra>
